<compile_context>
chip_gen: v5e
topology: v5e:2x2
jax: 0.10.0
libtpu: 0.0.40
codegen_flags: <defaults>
</compile_context>

<pallas_src>
from functools import partial

import jax
import jax.numpy as jnp
from jax.experimental import pallas as pl
from jax.experimental.pallas import tpu as pltpu


def _embed_cnn_highway_kernel(ids_ref, wcomb_ref, bconv_ref, whwy_ref, bhwy_ref,
                              out_ref, *, K, V, L_out, L_pad):
    """Fused char-embed + Conv1d + ReLU + max-pool + Highway for one tile of words.

    ids_ref  : (TN, L_pad + K - 1)  int32 char ids (padded with sentinel V)
    wcomb_ref: (K*V, C)             embedding folded into conv weight (C = padded Cout)
    bconv_ref: (1, C)               f32
    whwy_ref : (C, 2*C)             [w_proj | w_gate]
    bhwy_ref : (1, 2*C)             f32 [b_proj | b_gate]
    out_ref  : (TN, C)              f32
    """
    TN = ids_ref.shape[0]
    KV, C = wcomb_ref.shape
    mm_dtype = wcomb_ref.dtype

    ids = ids_ref[...]                                           # (TN, L_pad+K-1) int32

    # --- im2col one-hot built directly in the lane-dense (TN, L_pad, K*V) layout.
    # For each conv tap k: lane block [k*V, (k+1)*V) holds the value pattern 0..V-1,
    # all other lanes hold -1 (never matches an id).  Comparing the k-shifted ids
    # against that pattern writes the one-hot straight into its final lane position:
    # no sublane-shifted slices / concatenation of MB-scale float tensors.
    j_iota = jax.lax.broadcasted_iota(jnp.int32, (1, 1, KV), 2)   # tiny constant
    acc = None
    for k in range(K):
        ids_k = ids[:, k:k + L_pad]                               # (TN, L_pad) int32, ~KB
        in_blk = (j_iota >= k * V) & (j_iota < (k + 1) * V)
        v_pat_k = jnp.where(in_blk, j_iota - k * V, -1)           # (1, 1, KV) constant
        m = ids_k[:, :, None] == v_pat_k                          # (TN, L_pad, KV) bool
        acc = m if acc is None else (acc | m)
    windows = acc.astype(mm_dtype)                                # (TN, L_pad, KV)

    # --- conv as one MXU matmul.  L_pad % 8 == 0, so both reshapes are sublane-tile
    # aligned and do not materialize relayout copies.
    y = jnp.dot(windows.reshape(TN * L_pad, KV), wcomb_ref[...],
                preferred_element_type=jnp.float32)               # (TN*L_pad, C) f32
    y = y.reshape(TN, L_pad, C)

    # --- mask padded conv positions, max-pool; bias + ReLU hoisted out of the max.
    if L_pad != L_out:
        pos = jax.lax.broadcasted_iota(jnp.int32, (1, L_pad, 1), 1)
        y = jnp.where(pos < L_out, y, -jnp.inf)
    x_conv = jnp.maximum(jnp.max(y, axis=1) + bconv_ref[...], 0.0)  # (TN, C) f32

    # --- Highway: fused proj+gate matmul, then split; mix = conv + g*(proj - conv).
    h = jnp.dot(x_conv.astype(mm_dtype), whwy_ref[...],
                preferred_element_type=jnp.float32) + bhwy_ref[...]  # (TN, 2*C) f32
    x_proj = jnp.maximum(h[:, :C], 0.0)
    x_gate = jax.nn.sigmoid(h[:, C:])
    x_hwy = x_conv + x_gate * (x_proj - x_conv)

    # Dropout(p=0.3): eval-mode identity.
    # TODO(synk): training-mode dropout (pltpu.prng_*) not implemented; forward here is eval.
    out_ref[...] = x_hwy.astype(out_ref.dtype)


def model_embeddings_forward(input_ids, params, *, word_tile=256,
                             matmul_dtype=jnp.bfloat16):
    """input_ids: int32 (sentence_length, batch_size, max_word_length)
       returns  : f32   (sentence_length, batch_size, embed_size)

    matmul_dtype=jnp.bfloat16 (default) uses the native MXU path; f32 accumulation,
    biases and the nonlinearity path stay f32.  Pass jnp.float32 for bit-tighter math.
    """
    S, B, L = input_ids.shape
    char_emb = params["char_emb"]                       # (V, Cin)
    V, Cin = char_emb.shape
    KCin, Cout = params["w_conv"].shape
    K = KCin // Cin
    assert L >= K, "max_word_length must be >= conv kernel size"

    L_out = L - K + 1
    L_pad = ((L_out + 7) // 8) * 8                      # sublane-aligned conv positions
    L_ids = L_pad + K - 1                               # char axis so every window is in range

    N = S * B
    # Keep >= 2 grid steps when the workload allows it so v7x's two TensorCores both
    # get work (the "parallel" axis shards across cores); costs one extra ~0.35us grid
    # step at most on single-TC v5e/v6e.
    wt = word_tile
    if N >= 16:
        wt = min(wt, ((N + 1) // 2 + 7) // 8 * 8)
    wt = max(wt, 8)
    n_tiles = pl.cdiv(N, wt)
    N_pad = n_tiles * wt

    Cout_pad = ((Cout + 127) // 128) * 128              # lane-dense output channels
    pc = Cout_pad - Cout

    # Char ids, flattened over words.  Pad tail words (rows, results discarded) and the
    # char axis (sentinel V: never matches any real char id, so its one-hot is zero).
    ids = input_ids.reshape(N, L).astype(jnp.int32)
    ids = jnp.pad(ids, ((0, N_pad - N), (0, L_ids - L)), constant_values=V)

    # Fold the char-embedding table into the conv weight so the in-kernel lookup + conv
    # is a single one-hot matmul against (K*V, Cout_pad); row order k*V + v matches the
    # in-kernel lane order.
    w_conv_kic = params["w_conv"].reshape(K, Cin, Cout)             # (K, Cin, Cout)
    w_comb = jnp.einsum("vi,kic->kvc", char_emb, w_conv_kic,
                        precision=jax.lax.Precision.HIGHEST).reshape(K * V, Cout)

    # Zero-pad all output-channel dims to Cout_pad (padded channels stay exactly 0
    # through ReLU/max/highway and are stripped below).
    w_comb = jnp.pad(w_comb, ((0, 0), (0, pc))).astype(matmul_dtype)
    b_conv = jnp.pad(params["b_conv"], ((0, 0), (0, pc))).astype(jnp.float32)
    w_proj = jnp.pad(params["w_proj"], ((0, pc), (0, pc)))
    w_gate = jnp.pad(params["w_gate"], ((0, pc), (0, pc)))
    b_proj = jnp.pad(params["b_proj"], ((0, 0), (0, pc)))
    b_gate = jnp.pad(params["b_gate"], ((0, 0), (0, pc)))
    w_hwy = jnp.concatenate([w_proj, w_gate], axis=1).astype(matmul_dtype)   # (C, 2C)
    b_hwy = jnp.concatenate([b_proj, b_gate], axis=1).astype(jnp.float32)    # (1, 2C)

    kernel = partial(_embed_cnn_highway_kernel, K=K, V=V, L_out=L_out, L_pad=L_pad)
    out = pl.pallas_call(
        kernel,
        out_shape=jax.ShapeDtypeStruct((N_pad, Cout_pad), jnp.float32),
        grid_spec=pltpu.PrefetchScalarGridSpec(
            num_scalar_prefetch=0,
            grid=(n_tiles,),
            in_specs=[
                pl.BlockSpec((wt, L_ids),               lambda i: (i, 0)),  # char ids
                pl.BlockSpec((K * V, Cout_pad),         lambda i: (0, 0)),  # folded emb+conv
                pl.BlockSpec((1, Cout_pad),             lambda i: (0, 0)),  # b_conv (f32)
                pl.BlockSpec((Cout_pad, 2 * Cout_pad),  lambda i: (0, 0)),  # highway weight
                pl.BlockSpec((1, 2 * Cout_pad),         lambda i: (0, 0)),  # highway bias (f32)
            ],
            out_specs=pl.BlockSpec((wt, Cout_pad), lambda i: (i, 0)),
        ),
        compiler_params=pltpu.CompilerParams(
            dimension_semantics=("parallel",),
            # explicit scoped-VMEM budget: above v5e's 16 MiB default, below v7x's
            # 64 MiB physical, plenty of headroom for the per-tile intermediates here.
            vmem_limit_bytes=48 * 1024 * 1024,
        ),
    )(ids, w_comb, b_conv, w_hwy, b_hwy)

    return out[:N, :Cout].reshape(S, B, Cout)


def _reference_forward(input_ids, params):
    """Pure-JAX reference with the original (unfused, unfolded) math."""
    S, B, L = input_ids.shape
    Cin = params["char_emb"].shape[1]
    KCin, Cout = params["w_conv"].shape
    K = KCin // Cin
    N = S * B
    x = jnp.take(params["char_emb"], input_ids.reshape(N, L), axis=0)   # (N, L, Cin)
    outs = []
    for t in range(L - K + 1):
        win = x[:, t:t + K, :].reshape(N, K * Cin)
        outs.append(jnp.maximum(win @ params["w_conv"] + params["b_conv"], 0.0))
    x_conv = jnp.max(jnp.stack(outs, 0), axis=0)
    x_proj = jnp.maximum(x_conv @ params["w_proj"] + params["b_proj"], 0.0)
    x_gate = jax.nn.sigmoid(x_conv @ params["w_gate"] + params["b_gate"])
    x_hwy = x_gate * x_proj + (1.0 - x_gate) * x_conv
    return x_hwy.reshape(S, B, Cout)


def init_params(key, *, vocab_size, char_dim, embed_size, kernel_size, pad_idx=0):
    ks = jax.random.split(key, 6)
    char_emb = 0.1 * jax.random.normal(ks[0], (vocab_size, char_dim), jnp.float32)
    char_emb = char_emb.at[pad_idx].set(0.0)            # padding_idx row zeroed
    # PyTorch Conv1d weight (Cout, Cin, K) stored flattened as (K*Cin, Cout).
    w_conv_t = 0.1 * jax.random.normal(ks[1], (embed_size, char_dim, kernel_size), jnp.float32)
    w_conv = jnp.transpose(w_conv_t, (2, 1, 0)).reshape(kernel_size * char_dim, embed_size)
    b_conv = 0.01 * jax.random.normal(ks[2], (1, embed_size), jnp.float32)
    w_proj = 0.1 * jax.random.normal(ks[3], (embed_size, embed_size), jnp.float32)
    b_proj = jnp.zeros((1, embed_size), jnp.float32)
    w_gate = 0.1 * jax.random.normal(ks[4], (embed_size, embed_size), jnp.float32)
    b_gate = 0.01 * jax.random.normal(ks[5], (1, embed_size), jnp.float32)
    return dict(char_emb=char_emb, w_conv=w_conv, b_conv=b_conv,
                w_proj=w_proj, b_proj=b_proj, w_gate=w_gate, b_gate=b_gate)


if __name__ == "__main__":
    key = jax.random.PRNGKey(0)
    sentence_length, batch_size, max_word_length = 8, 2, 16
    embed_size, char_dim, vocab_size, kernel_size = 32, 50, 30, 5

    k_in, k_par = jax.random.split(key)
    input_ids = jax.random.randint(
        k_in, (sentence_length, batch_size, max_word_length), 0, vocab_size, jnp.int32)
    params = init_params(k_par, vocab_size=vocab_size, char_dim=char_dim,
                         embed_size=embed_size, kernel_size=kernel_size)

    ref = _reference_forward(input_ids, params)

    # f32-matmul path: tight check that the restructured kernel math is exact.
    out_f32 = model_embeddings_forward(input_ids, params, matmul_dtype=jnp.float32)
    out_f32 = jax.block_until_ready(out_f32)
    assert out_f32.shape == (sentence_length, batch_size, embed_size)
    assert jnp.allclose(out_f32, ref, atol=1e-4, rtol=1e-4), "f32 path mismatch vs reference"

    # Default bf16-matmul path (production config): looser tolerance for weight rounding.
    out_bf16 = model_embeddings_forward(input_ids, params)
    out_bf16 = jax.block_until_ready(out_bf16)
    assert out_bf16.shape == (sentence_length, batch_size, embed_size)
    assert jnp.allclose(out_bf16, ref, atol=3e-2, rtol=3e-2), "bf16 path mismatch vs reference"

    print("KERNEL_OK")
</pallas_src>

<mosaic_0001>
module attributes {stable_mosaic.version = 11 : i64} {
  func.func @_embed_cnn_highway_kernel(%arg0: i32, %arg1: memref<8x20xi32, #tpu.memory_space<vmem>>, %arg2: memref<150x128xf32, #tpu.memory_space<vmem>>, %arg3: memref<1x128xf32, #tpu.memory_space<vmem>>, %arg4: memref<128x256xf32, #tpu.memory_space<vmem>>, %arg5: memref<1x256xf32, #tpu.memory_space<vmem>>, %arg6: memref<8x128xf32, #tpu.memory_space<vmem>>) attributes {dimension_semantics = [#tpu.dimension_semantics<parallel>], iteration_bounds = array<i64: 2>, scalar_prefetch = 0 : i64, scratch_operands = 0 : i64, tpu.core_type = #tpu.core_type<tc>, window_params = [{transform_indices = @transform_0, window_bounds = array<i64: 8, 20>}, {pipeline_mode = #tpu.pipeline_mode<synchronous>, transform_indices = @transform_1, window_bounds = array<i64: 150, 128>}, {pipeline_mode = #tpu.pipeline_mode<synchronous>, transform_indices = @transform_2, window_bounds = array<i64: 1, 128>}, {pipeline_mode = #tpu.pipeline_mode<synchronous>, transform_indices = @transform_3, window_bounds = array<i64: 128, 256>}, {pipeline_mode = #tpu.pipeline_mode<synchronous>, transform_indices = @transform_4, window_bounds = array<i64: 1, 256>}, {transform_indices = @transform_5, window_bounds = array<i64: 8, 128>}]} {
    %c0 = arith.constant 0 : index
    %c0_0 = arith.constant 0 : index
    %0 = vector.load %arg1[%c0, %c0_0] : memref<8x20xi32, #tpu.memory_space<vmem>>, vector<8x20xi32>
    %1 = tpu.iota {dimensions = array<i32: 2>} : vector<1x1x150xi32>
    %2 = vector.extract_strided_slice %0 {offsets = [0, 0], sizes = [8, 16], strides = [1, 1]} : vector<8x20xi32> to vector<8x16xi32>
    %c0_i32 = arith.constant 0 : i32
    %3 = vector.broadcast %c0_i32 : i32 to vector<1x1x150xi32>
    %4 = arith.cmpi sge, %1, %3 : vector<1x1x150xi32>
    %c30_i32 = arith.constant 30 : i32
    %5 = vector.broadcast %c30_i32 : i32 to vector<1x1x150xi32>
    %6 = arith.cmpi slt, %1, %5 : vector<1x1x150xi32>
    %7 = arith.andi %4, %6 : vector<1x1x150xi1>
    %c0_i32_1 = arith.constant 0 : i32
    %8 = vector.broadcast %c0_i32_1 : i32 to vector<1x1x150xi32>
    %9 = arith.subi %1, %8 : vector<1x1x150xi32>
    %c-1_i32 = arith.constant -1 : i32
    %10 = vector.broadcast %c-1_i32 : i32 to vector<1x1x150xi32>
    %11 = arith.select %7, %9, %10 : vector<1x1x150xi1>, vector<1x1x150xi32>
    %12 = vector.shape_cast %2 : vector<8x16xi32> to vector<8x16x1xi32>
    %13 = vector.broadcast %12 : vector<8x16x1xi32> to vector<8x16x150xi32>
    %14 = vector.broadcast %11 : vector<1x1x150xi32> to vector<8x16x150xi32>
    %15 = arith.cmpi eq, %13, %14 : vector<8x16x150xi32>
    %16 = vector.extract_strided_slice %0 {offsets = [0, 1], sizes = [8, 16], strides = [1, 1]} : vector<8x20xi32> to vector<8x16xi32>
    %c30_i32_2 = arith.constant 30 : i32
    %17 = vector.broadcast %c30_i32_2 : i32 to vector<1x1x150xi32>
    %18 = arith.cmpi sge, %1, %17 : vector<1x1x150xi32>
    %c60_i32 = arith.constant 60 : i32
    %19 = vector.broadcast %c60_i32 : i32 to vector<1x1x150xi32>
    %20 = arith.cmpi slt, %1, %19 : vector<1x1x150xi32>
    %21 = arith.andi %18, %20 : vector<1x1x150xi1>
    %c30_i32_3 = arith.constant 30 : i32
    %22 = vector.broadcast %c30_i32_3 : i32 to vector<1x1x150xi32>
    %23 = arith.subi %1, %22 : vector<1x1x150xi32>
    %c-1_i32_4 = arith.constant -1 : i32
    %24 = vector.broadcast %c-1_i32_4 : i32 to vector<1x1x150xi32>
    %25 = arith.select %21, %23, %24 : vector<1x1x150xi1>, vector<1x1x150xi32>
    %26 = vector.shape_cast %16 : vector<8x16xi32> to vector<8x16x1xi32>
    %27 = vector.broadcast %26 : vector<8x16x1xi32> to vector<8x16x150xi32>
    %28 = vector.broadcast %25 : vector<1x1x150xi32> to vector<8x16x150xi32>
    %29 = arith.cmpi eq, %27, %28 : vector<8x16x150xi32>
    %30 = arith.ori %15, %29 : vector<8x16x150xi1>
    %31 = vector.extract_strided_slice %0 {offsets = [0, 2], sizes = [8, 16], strides = [1, 1]} : vector<8x20xi32> to vector<8x16xi32>
    %c60_i32_5 = arith.constant 60 : i32
    %32 = vector.broadcast %c60_i32_5 : i32 to vector<1x1x150xi32>
    %33 = arith.cmpi sge, %1, %32 : vector<1x1x150xi32>
    %c90_i32 = arith.constant 90 : i32
    %34 = vector.broadcast %c90_i32 : i32 to vector<1x1x150xi32>
    %35 = arith.cmpi slt, %1, %34 : vector<1x1x150xi32>
    %36 = arith.andi %33, %35 : vector<1x1x150xi1>
    %c60_i32_6 = arith.constant 60 : i32
    %37 = vector.broadcast %c60_i32_6 : i32 to vector<1x1x150xi32>
    %38 = arith.subi %1, %37 : vector<1x1x150xi32>
    %c-1_i32_7 = arith.constant -1 : i32
    %39 = vector.broadcast %c-1_i32_7 : i32 to vector<1x1x150xi32>
    %40 = arith.select %36, %38, %39 : vector<1x1x150xi1>, vector<1x1x150xi32>
    %41 = vector.shape_cast %31 : vector<8x16xi32> to vector<8x16x1xi32>
    %42 = vector.broadcast %41 : vector<8x16x1xi32> to vector<8x16x150xi32>
    %43 = vector.broadcast %40 : vector<1x1x150xi32> to vector<8x16x150xi32>
    %44 = arith.cmpi eq, %42, %43 : vector<8x16x150xi32>
    %45 = arith.ori %30, %44 : vector<8x16x150xi1>
    %46 = vector.extract_strided_slice %0 {offsets = [0, 3], sizes = [8, 16], strides = [1, 1]} : vector<8x20xi32> to vector<8x16xi32>
    %c90_i32_8 = arith.constant 90 : i32
    %47 = vector.broadcast %c90_i32_8 : i32 to vector<1x1x150xi32>
    %48 = arith.cmpi sge, %1, %47 : vector<1x1x150xi32>
    %c120_i32 = arith.constant 120 : i32
    %49 = vector.broadcast %c120_i32 : i32 to vector<1x1x150xi32>
    %50 = arith.cmpi slt, %1, %49 : vector<1x1x150xi32>
    %51 = arith.andi %48, %50 : vector<1x1x150xi1>
    %c90_i32_9 = arith.constant 90 : i32
    %52 = vector.broadcast %c90_i32_9 : i32 to vector<1x1x150xi32>
    %53 = arith.subi %1, %52 : vector<1x1x150xi32>
    %c-1_i32_10 = arith.constant -1 : i32
    %54 = vector.broadcast %c-1_i32_10 : i32 to vector<1x1x150xi32>
    %55 = arith.select %51, %53, %54 : vector<1x1x150xi1>, vector<1x1x150xi32>
    %56 = vector.shape_cast %46 : vector<8x16xi32> to vector<8x16x1xi32>
    %57 = vector.broadcast %56 : vector<8x16x1xi32> to vector<8x16x150xi32>
    %58 = vector.broadcast %55 : vector<1x1x150xi32> to vector<8x16x150xi32>
    %59 = arith.cmpi eq, %57, %58 : vector<8x16x150xi32>
    %60 = arith.ori %45, %59 : vector<8x16x150xi1>
    %61 = vector.extract_strided_slice %0 {offsets = [0, 4], sizes = [8, 16], strides = [1, 1]} : vector<8x20xi32> to vector<8x16xi32>
    %c120_i32_11 = arith.constant 120 : i32
    %62 = vector.broadcast %c120_i32_11 : i32 to vector<1x1x150xi32>
    %63 = arith.cmpi sge, %1, %62 : vector<1x1x150xi32>
    %c150_i32 = arith.constant 150 : i32
    %64 = vector.broadcast %c150_i32 : i32 to vector<1x1x150xi32>
    %65 = arith.cmpi slt, %1, %64 : vector<1x1x150xi32>
    %66 = arith.andi %63, %65 : vector<1x1x150xi1>
    %c120_i32_12 = arith.constant 120 : i32
    %67 = vector.broadcast %c120_i32_12 : i32 to vector<1x1x150xi32>
    %68 = arith.subi %1, %67 : vector<1x1x150xi32>
    %c-1_i32_13 = arith.constant -1 : i32
    %69 = vector.broadcast %c-1_i32_13 : i32 to vector<1x1x150xi32>
    %70 = arith.select %66, %68, %69 : vector<1x1x150xi1>, vector<1x1x150xi32>
    %71 = vector.shape_cast %61 : vector<8x16xi32> to vector<8x16x1xi32>
    %72 = vector.broadcast %71 : vector<8x16x1xi32> to vector<8x16x150xi32>
    %73 = vector.broadcast %70 : vector<1x1x150xi32> to vector<8x16x150xi32>
    %74 = arith.cmpi eq, %72, %73 : vector<8x16x150xi32>
    %75 = arith.ori %60, %74 : vector<8x16x150xi1>
    %76 = arith.extui %75 : vector<8x16x150xi1> to vector<8x16x150xi32>
    %77 = arith.sitofp %76 : vector<8x16x150xi32> to vector<8x16x150xf32>
    %78 = vector.shape_cast %77 : vector<8x16x150xf32> to vector<128x150xf32>
    %c0_14 = arith.constant 0 : index
    %c0_15 = arith.constant 0 : index
    %79 = vector.load %arg2[%c0_14, %c0_15] : memref<150x128xf32, #tpu.memory_space<vmem>>, vector<150x128xf32>
    %cst = arith.constant dense<0.000000e+00> : vector<128x128xf32>
    %80 = tpu.matmul %78, %79, %cst {dimension_numbers = #tpu.dot_dimension_numbers<[1], [0], [0], [1], [0, 0, 1, 1], [], []>} : vector<128x150xf32>, vector<150x128xf32>, vector<128x128xf32> -> vector<128x128xf32>
    %81 = vector.shape_cast %80 : vector<128x128xf32> to vector<8x16x128xf32>
    %82 = tpu.iota {dimensions = array<i32: 1>} : vector<1x16x1xi32>
    %c12_i32 = arith.constant 12 : i32
    %83 = vector.broadcast %c12_i32 : i32 to vector<1x16x1xi32>
    %84 = arith.cmpi slt, %82, %83 : vector<1x16x1xi32>
    %cst_16 = arith.constant 0xFF800000 : f32
    %85 = vector.shape_cast %84 : vector<1x16x1xi1> to vector<1x16x1xi1>
    %86 = vector.broadcast %85 : vector<1x16x1xi1> to vector<8x16x128xi1>
    %87 = vector.broadcast %cst_16 : f32 to vector<8x16x128xf32>
    %88 = arith.select %86, %81, %87 : vector<8x16x128xi1>, vector<8x16x128xf32>
    %cst_17 = arith.constant dense<0xFF800000> : vector<8x128xf32>
    %89 = vector.multi_reduction <maximumf>, %88, %cst_17 [1] : vector<8x16x128xf32> to vector<8x128xf32>
    %c0_18 = arith.constant 0 : index
    %c0_19 = arith.constant 0 : index
    %90 = vector.load %arg3[%c0_18, %c0_19] : memref<1x128xf32, #tpu.memory_space<vmem>>, vector<1x128xf32>
    %91 = vector.broadcast %90 : vector<1x128xf32> to vector<8x128xf32>
    %92 = arith.addf %89, %91 : vector<8x128xf32>
    %cst_20 = arith.constant 0.000000e+00 : f32
    %93 = vector.broadcast %cst_20 : f32 to vector<8x128xf32>
    %94 = arith.maximumf %92, %93 : vector<8x128xf32>
    %c0_21 = arith.constant 0 : index
    %c0_22 = arith.constant 0 : index
    %95 = vector.load %arg4[%c0_21, %c0_22] : memref<128x256xf32, #tpu.memory_space<vmem>>, vector<128x256xf32>
    %cst_23 = arith.constant dense<0.000000e+00> : vector<8x256xf32>
    %96 = tpu.matmul %94, %95, %cst_23 {dimension_numbers = #tpu.dot_dimension_numbers<[1], [0], [0], [1], [0, 0, 1, 1], [], []>} : vector<8x128xf32>, vector<128x256xf32>, vector<8x256xf32> -> vector<8x256xf32>
    %c0_24 = arith.constant 0 : index
    %c0_25 = arith.constant 0 : index
    %97 = vector.load %arg5[%c0_24, %c0_25] : memref<1x256xf32, #tpu.memory_space<vmem>>, vector<1x256xf32>
    %98 = vector.broadcast %97 : vector<1x256xf32> to vector<8x256xf32>
    %99 = arith.addf %96, %98 : vector<8x256xf32>
    %100 = vector.extract_strided_slice %99 {offsets = [0, 0], sizes = [8, 128], strides = [1, 1]} : vector<8x256xf32> to vector<8x128xf32>
    %cst_26 = arith.constant 0.000000e+00 : f32
    %101 = vector.broadcast %cst_26 : f32 to vector<8x128xf32>
    %102 = arith.maximumf %100, %101 : vector<8x128xf32>
    %103 = vector.extract_strided_slice %99 {offsets = [0, 128], sizes = [8, 128], strides = [1, 1]} : vector<8x256xf32> to vector<8x128xf32>
    %104 = arith.negf %103 : vector<8x128xf32>
    %105 = math.exp %104 : vector<8x128xf32>
    %cst_27 = arith.constant 1.000000e+00 : f32
    %106 = vector.broadcast %cst_27 : f32 to vector<8x128xf32>
    %107 = arith.addf %106, %105 : vector<8x128xf32>
    %108 = arith.divf %106, %107 : vector<8x128xf32>
    %109 = arith.subf %102, %94 : vector<8x128xf32>
    %110 = arith.mulf %108, %109 : vector<8x128xf32>
    %111 = arith.addf %94, %110 : vector<8x128xf32>
    %c0_28 = arith.constant 0 : index
    %c0_29 = arith.constant 0 : index
    %112 = vector.load %arg6[%c0_28, %c0_29] : memref<8x128xf32, #tpu.memory_space<vmem>>, vector<8x128xf32>
    tpu.vector_store %arg6[%c0_28, %c0_29], %111 {strides = array<i32>} : memref<8x128xf32, #tpu.memory_space<vmem>>, vector<8x128xf32>,
    return
  }
  func.func @transform_0(%arg0: i32) -> (i32, i32) {
    %c0_i32 = arith.constant 0 : i32
    %c0_i32_0 = arith.constant 0 : i32
    return %arg0, %c0_i32 : i32, i32
  }
  func.func @transform_1(%arg0: i32) -> (i32, i32) {
    %c0_i32 = arith.constant 0 : i32
    %c0_i32_0 = arith.constant 0 : i32
    %c0_i32_1 = arith.constant 0 : i32
    return %c0_i32, %c0_i32_0 : i32, i32
  }
  func.func @transform_2(%arg0: i32) -> (i32, i32) {
    %c0_i32 = arith.constant 0 : i32
    %c0_i32_0 = arith.constant 0 : i32
    %c0_i32_1 = arith.constant 0 : i32
    return %c0_i32, %c0_i32_0 : i32, i32
  }
  func.func @transform_3(%arg0: i32) -> (i32, i32) {
    %c0_i32 = arith.constant 0 : i32
    %c0_i32_0 = arith.constant 0 : i32
    %c0_i32_1 = arith.constant 0 : i32
    return %c0_i32, %c0_i32_0 : i32, i32
  }
  func.func @transform_4(%arg0: i32) -> (i32, i32) {
    %c0_i32 = arith.constant 0 : i32
    %c0_i32_0 = arith.constant 0 : i32
    %c0_i32_1 = arith.constant 0 : i32
    return %c0_i32, %c0_i32_0 : i32, i32
  }
  func.func @transform_5(%arg0: i32) -> (i32, i32) {
    %c0_i32 = arith.constant 0 : i32
    %c0_i32_0 = arith.constant 0 : i32
    return %arg0, %c0_i32 : i32, i32
  }
}

</mosaic_0001>

<bundles_post_ra>
// kernel: tpu_custom_call.1
= control target key start
LH: loop header
LB: loop body
LE: loop exit
PB: predicated region body
PF: predicated region fallthrough
CT: control target
= control target key end

     0   :  { %10 = vsyncpa [#allocation3], 0  ;;  %s2968_s0 = inlined_call_operand.hbm [shape: s32[16,20], index: 0, kind: input, shape index: {}]   ;;  %s2969_s1 = inlined_call_operand.hbm [shape: f32[150,128], index: 1, kind: input, shape index: {}]   ;;  %s2970_s2 = inlined_call_operand.vmem [shape: f32[1,128], index: 2, kind: input, shape index: {}]   ;;  %s2971_s3 = inlined_call_operand.hbm [shape: f32[128,256], index: 3, kind: input, shape index: {}]   ;;  %s2972_s4 = inlined_call_operand.vmem [shape: f32[1,256], index: 4, kind: input, shape index: {}]   ;;  %s2973_s5 = inlined_call_operand.hbm [shape: f32[16,128], index: 5, kind: output, shape index: {}]  }
   0x1   :  { %12 = vsyncpa [#allocation3 + $0x1], 0 }
   0x2   :  { %13 = vsyncpa [#allocation6], 0 }
   0x3   :  { %14 = vsyncpa [#allocation4], 0 }
   0x4   :  { %16 = vsyncpa [#allocation4 + $0x1], 0  ;;  %s2212_s18 = smov 0   ;;  %s2214_s19 = smov 0  }
   0x5   :  { %s2216_s20 = smov 0   ;;  %s2218_s21 = smov 0  }
   0x6 LB: > { %s174_s24 = sshll.u32 %s2969_s1, 4  ;;  %s2236_s25 = sadd.s32 4294967295, %s2173_s21   ;;  %s2173_s21 = sphi %s2218_s21, %s3035_s21   ;;  %s2169_s20 = sphi %s2216_s20, %s3034_s20   ;;  %s2165_s19 = sphi %s2214_s19, %s3033_s19   ;;  %s2161_s18 = sphi %s2212_s18, %s3032_s18   ;;  %s175_s24 = int_to_ptr.hbm [resolvable:$true] %s174_s24 }
   0x7   : > { %p1754_p0 = scmp.ge.s32.totalorder %s2173_s21, 1  ;;  %p43_p1 = scmp.eq.s32.totalorder %s2236_s25, 0 }
   0x8   : > { %p163_p2 = scmp.lt.s32.totalorder %s2173_s21, 3  ;;  %s2175_s27 = smov [#allocation5]  }
   0x9   : > { %s176_s28 = sshll.u32 %s2175_s27, 4  ;;  %s191_s6 = sshll.u32 %s2971_s3, 4  ;;  %s177_s28 = int_to_ptr.vmem [resolvable:$true] %s176_s28  ;;  %s192_s6 = int_to_ptr.hbm [resolvable:$true] %s191_s6 }
   0xa   : > { %p2241_p3 = pnand %p1754_p0, %p163_p2  ;;  %s2176_s7 = smov [#allocation7]  }
   0xb   : > { %s193_s8 = sshll.u32 %s2176_s7, 4  ;;  %s2177_s9 = smov 128   ;;  %s194_s8 = int_to_ptr.vmem [resolvable:$true] %s193_s8 }
   0xc   : > { %p1874_p4 = pneg %p2241_p3  ;;  %s2178_s10 = smov 8  }
   0xd   : > { %s2179_s11 = smov 256   ;;  %s2180_s12 = smov 16  }
   0xe   : > { %p1875_p6 = pnand %p1874_p4, %p43_p1  ;;  %s1753_s13 = sadd.s32 4294967294, %s2173_s21  }
   0xf   : > { %s2255_s14 = sadd.s32 1, %s2173_s21   ;;  %s29_s16 = sadd.s32 1, %s2169_s20 }
  0x10   : > { %1877 = dma.hbm_to_vmem [thread:$0]  (!%p1875_p6), %s175_s24, 2432, %s177_s28, [#allocation6], %s2177_s9, %s2177_s9, %s2178_s10  }
  0x11   : > { %1880 = dma.hbm_to_vmem [thread:$0]  (!%p1875_p6), %s192_s6, 4096, %s194_s8, [#allocation6], %s2179_s11, %s2179_s11, %s2180_s12  }
  0x12   : > { %s26_s15 = ssub.s32 %s2173_s21, %s2255_s14  ;;  %p36_p8 = scmp.ne.s32.totalorder %s2169_s20, %s2165_s19 }
  0x13   : > { %p27_p7 = scmp.eq.s32.totalorder %s26_s15, 0  ;;  %p37_p9 = scmp.eq.s32.totalorder %s2173_s21, 0 }
  0x14   : > { %p42_p10 = scmp.ne.s32.totalorder %s2165_s19, %s2161_s18  ;;  %p150_p13 = scmp.eq.s32.totalorder %s2236_s25, 1 }
  0x15   : > { %s2266_s17 = scalar_select %p27_p7, %s2169_s20, %s29_s16  }
  0x16   : > { %p2268_p11 = por %p37_p9, %p36_p8  ;;  %p2274_p12 = por %p43_p1, %p42_p10 }
  0x17   : > { %p156_p0 = scmp.eq.s32.totalorder %s1753_s13, 1  ;;  %p1891_p2 = scmp.lt.s32.totalorder %s2173_s21, 2 }
  0x18   : > { %s210_s24 = sand.u32 1, %s2169_s20   ;;  %p2281_p4 = por %p150_p13, %p36_p8 }
  0x19   : > { %p2285_p6 = por %p156_p0, %p42_p10  ;;  %s1758_s29 = sshll.u32 %s210_s24, 3 }
  0x1a   : > { %s1759_s30 = sshll.u32 %s2173_s21, 3  ;;  %s214_s9 = scalar_lea.vmem [#allocation2], %s1758_s29 }
  0x1b   : > { %s218_s8 = scalar_lea.hbm %s2968_s0, %s1759_s30  ;;  %s222_s10 = sshll.u32 %s214_s9, 4  ;;  %s223_s10 = int_to_ptr.vmem [resolvable:$true] %s222_s10 }
  0x1c   : > { %s220_s11 = sshll.u32 %s218_s8, 4  ;;  %p2295_p7 = pnand %p1891_p2, %p2268_p11  ;;  %s221_s11 = int_to_ptr.hbm [resolvable:$true] %s220_s11 }
  0x1d   : > { %s211_s13 = scalar_lea.sflag [#allocation3], %s210_s24  ;;  %s2073_s15 = sshra.s32 %s221_s11, 4  ;;  %s2074_s15 = int_to_ptr.hbm [resolvable:$true] %s2073_s15 }
  0x1e   : > { %s2075_s16 = scalar_lea.hbm %s2074_s15, 8  ;;  %p2077_p9 = pneg %p2295_p7 }
  0x1f   : > { %p2076_p8 = scmp.ne.s32.totalorder %s2074_s15, %s2075_s16  ;;  %s2080_s6 = scalar_lea.hbm %s2968_s0, 16 }
  0x20   : > { %p2081_p11 = scmp.lt.s32.totalorder %s2074_s15, %s2968_s0  ;;  %p2082_p0 = scmp.lt.s32.totalorder %s2080_s6, %s2075_s16 }
  0x21   : > { %p2078_p10 = pnand %p2077_p9, %p2076_p8 }
  0x22   : > { %p2083_p2 = por %p2082_p0, %p2081_p11 }
  0x23   : > { %p2079_p13 = pneg %p2078_p10 }
  0x25   : > { %p2084_p5 = pnand %p2083_p2, %p2079_p13 }
  0x27   : > { %2087 = shalt.err (!%p2084_p5)
}
  0x28   : > { %1884 = dma.hbm_to_vmem [thread:$0]  (!%p2295_p7), %s221_s11, 128, %s223_s10, %s211_s13  }
  0x29   : > { %231 = sbr.rel (%p2241_p3) target bundleno = 1011 (0x3f3), region = 40  ;;  %s2312_s24 = sand.u32 (!%p2241_p3), 1, %s2165_s19  }
  0x2a   : > { %s1761_s8 = sshll.u32 (!%p2241_p3), %s2312_s24, 3  ;;  %s234_s9 = scalar_lea.sflag (!%p2241_p3), [#allocation3], %s2312_s24 }
  0x2b   : > { %s237_s15 = scalar_lea.vmem (!%p2241_p3), [#allocation2], %s1761_s8 }
  0x2e   : > { %2148 = dma.done.wait (%p2274_p12), %s234_s9, 128  }
  0x2f   : > { %2150 = vsyncadd (%p2274_p12), %s234_s9, 4294967168 }
  0x30   : > { %2152 = dma.done.wait (%p43_p1), [#allocation6], 6528  }
  0x31   : > { %2154 = vsyncadd (%p43_p1), [#allocation6], 4294960768  ;;  %v276_v0 = vlaneseq  ;;  %v2332_v2 = vld [vmem:[%s237_s15] sm:$0xff]  ;;  %v1180_v18 = vld [vmem:[#allocation5 + $0x68] sm:$0xff]  ;;  %vm1235_vm0 = vcmask 1045504   ;;  %v2181_v60 = vmov 0.0  }
  0x32   : > { %v2335_v3 = vperm.slane %v2332_v2, 2  ;;  %v2338_v4 = vperm.slane %v2332_v2, 1  ;;  %v287_v5 = vperm.slane %v2332_v2, 0  ;;  %v2385_v15 = vperm.slane %v2332_v2, 4  ;;  %v1182_v16 = vld [vmem:[#allocation5 + $0x78] sm:$0xff]  ;;  %v1181_v17 = vld [vmem:[#allocation5 + $0x70] sm:$0xff] }
  0x33   : > { %v2327_v1 = vshrl.u32 %v276_v0, 7  ;;  %1239 = vmatpush.msra.mxu0 %v1182_v16  ;;  %1827 = vmatpush.msra.mxu2 %v1182_v16  ;;  %v1179_v19 = vld [vmem:[#allocation5 + $0x60] sm:$0xff]  ;;  %v1178_v20 = vld [vmem:[#allocation5 + $0x58] sm:$0xff]  ;;  %v1177_v21 = vld [vmem:[#allocation5 + $0x50] sm:$0xff]  ;;  %v2405_v29 = vperm.slane %v2332_v2, 5  ;;  %v277_v39 = vand.u32 127, %v276_v0 }
  0x34   : > { %1828 = vmatpush.msra.mxu3 %v1182_v16  ;;  %v1176_v22 = vld [vmem:[#allocation5 + $0x48] sm:$0xff]  ;;  %v1175_v23 = vld [vmem:[#allocation5 + $0x40] sm:$0xff]  ;;  %v1174_v24 = vld [vmem:[#allocation5 + $0x38] sm:$0xff]  ;;  %v2424_v42 = vperm.slane %v2332_v2, 3  ;;  %v2450_v59 = vperm.slane %v2332_v2, 6  ;;  %s1824_s12 = sshll.u32 %s2236_s25, 3 }
  0x35   : > { %1937 = vset.pattern.permute.xlu2 %v2327_v1  ;;  %1936 = vset.pattern.permute.xlu1 %v2327_v1  ;;  %v2344_v6 = vadd.s32 1, %v2327_v1  ;;  %v2347_v7 = vadd.s32 8, %v2327_v1  ;;  %v2354_v8 = vadd.s32 2, %v2327_v1  ;;  %v2357_v9 = vadd.s32 3, %v2327_v1  ;;  %v1173_v25 = vld [vmem:[#allocation5 + $0x30] sm:$0xff]  ;;  %v1172_v26 = vld [vmem:[#allocation5 + $0x28] sm:$0xff]  ;;  %s1659_s29 = scalar_lea.hbm %s2973_s5, %s1824_s12 }
  0x36   : > { %1934 = vset.pattern.permute.xlu0 %v2327_v1  ;;  %v2360_v10 = vadd.s32 4, %v2327_v1  ;;  %v2366_v11 = vadd.s32 9, %v2327_v1  ;;  %v2369_v12 = vadd.s32 10, %v2327_v1  ;;  %v2376_v13 = vadd.s32 11, %v2327_v1  ;;  %1240 = vmatpush.msra.mxu0 %v1181_v17  ;;  %v1171_v27 = vld [vmem:[#allocation5 + $0x20] sm:$0xff]  ;;  %v1170_v28 = vld [vmem:[#allocation5 + $0x18] sm:$0xff] }
  0x37   : > { %v2379_v14 = vadd.s32 12, %v2327_v1  ;;  %1829 = vmatpush.msra.mxu2 %v1181_v17  ;;  %1830 = vmatpush.msra.mxu3 %v1181_v17  ;;  %v1169_v30 = vld [vmem:[#allocation5 + $0x10] sm:$0xff]  ;;  %v1168_v32 = vld [vmem:[#allocation5 + $0x8] sm:$0xff]  ;;  %v1167_v34 = vld [vmem:[#allocation5] sm:$0xff]  ;;  %vm423_vm1 = vcmp.ge.s32.totalorder %v277_v39, 30  ;;  %vm425_vm2 = vcmp.lt.s32.totalorder %v277_v39, 60 }
  0x38   : > { %1241 = vmatpush.msra.mxu0 %v1180_v18  ;;  %v1185_v31 = vld [vmem:[#allocation5 + $0x90] sm:$0x3f]  ;;  %v1184_v33 = vld [vmem:[#allocation5 + $0x88] sm:$0xff]  ;;  %v1183_v35 = vld [vmem:[#allocation5 + $0x80] sm:$0xff]  ;;  %v1765_v40 = vadd.s32 4294967266, %v277_v39  ;;  %vm593_vm4 = vcmp.ge.s32.totalorder %v277_v39, 60 }
  0x39   : > { %1831 = vmatpush.msra.mxu2 %v1180_v18  ;;  %1832 = vmatpush.msra.mxu3 %v1180_v18  ;;  %vm427_vm3 = vmand %vm423_vm1, %vm425_vm2  ;;  %vm595_vm5 = vcmp.lt.s32.totalorder %v277_v39, 90  ;;  %vm281_vm6 = vcmp.lt.s32.totalorder %v277_v39, 30  ;;  %vm763_vm7 = vcmp.ge.s32.totalorder %v277_v39, 90  ;;  %vm765_vm8 = vcmp.lt.s32.totalorder %v277_v39, 120  ;;  %s274_s25 = scalar_lea.vmem [#allocation8], %s1761_s8  ;;  %s1663_s6 = sshll.u32 %s1659_s29, 4  ;;  %s1664_s6 = int_to_ptr.hbm [resolvable:$true] %s1663_s6 }
  0x3a   : > { %1242 = vmatpush.msra.mxu0 %v1179_v19  ;;  %1805 = vmatpush.msk.msra.mxu1 %vm1235_vm0, %v1185_v31  ;;  %v278_v45 = vadd.s32 128, %v277_v39  ;;  %v2431_v46 = vsel %vm427_vm3, %v1765_v40, 4294967295  ;;  %v1767_v47 = vadd.s32 4294967236, %v277_v39  ;;  %vm597_vm9 = vmand %vm593_vm4, %vm595_vm5  ;;  %v1769_v48 = vadd.s32 4294967206, %v277_v39  ;;  %s1661_s30 = sshll.u32 %s274_s25, 4  ;;  %s1649_s7 = scalar_lea.sflag [#allocation4], %s2312_s24  ;;  %s1662_s30 = int_to_ptr.vmem [resolvable:$true] %s1661_s30 }
  0x3b   : > { %1833 = vmatpush.msra.mxu2 %v1179_v19  ;;  %1834 = vmatpush.msra.mxu3 %v1179_v19  ;;  %v2433_v49 = vsel %vm281_vm6, %v277_v39, 4294967295  ;;  %vm767_vm10 = vmand %vm763_vm7, %vm765_vm8  ;;  %v1771_v50 = vadd.s32 4294967176, %v277_v39  ;;  %vm933_vm13 = vcmp.ge.s32.totalorder %v277_v39, 120  ;;  %s2117_s22 = sshra.s32 %s1664_s6, 4  ;;  %s2123_s26 = scalar_lea.hbm %s2973_s5, 16  ;;  %s2118_s22 = int_to_ptr.hbm [resolvable:$true] %s2117_s22 }
  0x3c   : > { %1243 = vmatpush.msra.mxu0 %v1178_v20  ;;  %1318 = vmatpush.msra.mxu1 %v1184_v33  ;;  %v1772_v51 = vadd.s32 4294967176, %v278_v45  ;;  %v2439_v52 = vsel %vm597_vm9, %v1767_v47, 4294967295  ;;  %v2441_v54 = vsel %vm767_vm10, %v1769_v48, 4294967295  ;;  %s2119_s8 = scalar_lea.hbm %s2118_s22, 8  ;;  %p2124_p12 = scmp.lt.s32.totalorder %s2118_s22, %s2973_s5 }
  0x3d   : > { %318 = vperm.xlu2 %1937, %v2335_v3   ;;  %305 = vperm.xlu1 %1936, %v2338_v4   ;;  %v2443_v56 = vsel %vm933_vm13, %v1771_v50, 4294967295  ;;  %p2120_p1 = scmp.ne.s32.totalorder %s2118_s22, %s2119_s8  ;;  %p2125_p7 = scmp.lt.s32.totalorder %s2123_s26, %s2119_s8 }
  0x3e   : > { %292 = vperm.xlu0 %1934, %v287_v5   ;;  %1244 = vmatpush.msra.mxu0 %v1177_v21 }
  0x3f   : > { %1835 = vmatpush.msra.mxu2 %v1178_v20  ;;  %1836 = vmatpush.msra.mxu3 %v1178_v20  ;;  %p2121_p3 = pnand %p2120_p1, %p2281_p4  ;;  %p2126_p8 = por %p2125_p7, %p2124_p12 }
  0x40   : > { %1245 = vmatpush.msra.mxu0 %v1176_v22  ;;  %1319 = vmatpush.msra.mxu1 %v1183_v35 }
  0x41   : > { %1837 = vmatpush.msra.mxu2 %v1177_v21  ;;  %1838 = vmatpush.msra.mxu3 %v1177_v21  ;;  %p2122_p5 = pneg %p2121_p3 }
  0x42   : > { %1246 = vmatpush.msra.mxu0 %v1175_v23 }
  0x43   : > { %1839 = vmatpush.msra.mxu2 %v1176_v22  ;;  %1840 = vmatpush.msra.mxu3 %v1176_v22  ;;  %p2127_p9 = pnand %p2126_p8, %p2122_p5 }
  0x44   : > { %1247 = vmatpush.msra.mxu0 %v1174_v24 }
  0x45   : > { %1939 = vset.pattern.permute.xlu2 %v2344_v6  ;;  %1938 = vset.pattern.permute.xlu1 %v2347_v7 }
  0x46   : > { %1935 = vset.pattern.permute.xlu0 %v2347_v7  ;;  %1841 = vmatpush.msra.mxu2 %v1175_v23 }
  0x47   : > { %1842 = vmatpush.msra.mxu3 %v1175_v23  ;;  %1248 = vmatpush.msra.mxu0 %v1173_v25 }
  0x48   : > { %1843 = vmatpush.msra.mxu2 %v1174_v24 }
  0x49   : > { %1844 = vmatpush.msra.mxu3 %v1174_v24  ;;  %1249 = vmatpush.msra.mxu0 %v1172_v26 }
  0x4a   : > { %1845 = vmatpush.msra.mxu2 %v1173_v25 }
  0x4b   : > { %1250 = vmatpush.msra.mxu0 %v1171_v27  ;;  %1846 = vmatpush.msra.mxu3 %v1173_v25 }
  0x4c   : > { %1847 = vmatpush.msra.mxu2 %v1172_v26 }
  0x4d   : > { %311 = vperm.xlu1 %1938, %v2338_v4   ;;  %437 = vperm.xlu2 %1939, %v287_v5  }
  0x4e   : > { %298 = vperm.xlu0 %1935, %v287_v5   ;;  %1251 = vmatpush.msra.mxu0 %v1170_v28 }
  0x4f   : > { %1849 = vmatpush.msra.mxu2 %v1171_v27  ;;  %1848 = vmatpush.msra.mxu3 %v1172_v26 }
  0x50   : > { %1252 = vmatpush.msra.mxu0 %v1169_v30 }
  0x51   : > { %1851 = vmatpush.msra.mxu2 %v1170_v28  ;;  %1850 = vmatpush.msra.mxu3 %v1171_v27 }
  0x52   : > { %1253 = vmatpush.msra.mxu0 %v1168_v32 }
  0x53   : > { %1853 = vmatpush.msra.mxu2 %v1169_v30  ;;  %1852 = vmatpush.msra.mxu3 %v1170_v28 }
  0x54   : > { %1254 = vmatpush.msra.mxu0 %v1167_v34 }
  0x55   : > { %1940 = vset.pattern.permute.xlu1 %v2354_v8  ;;  %1941 = vset.pattern.permute.xlu2 %v2357_v9 }
  0x56   : > { %1942 = vset.pattern.permute.xlu0 %v2360_v10  ;;  %1855 = vmatpush.msra.mxu2 %v1168_v32 }
  0x57   : > { %1854 = vmatpush.msra.mxu3 %v1169_v30 }
  0x58   : > { %1857 = vmatpush.msra.mxu2 %v1167_v34 }
  0x59   : > { %1856 = vmatpush.msra.mxu3 %v1168_v32 }
  0x5b   : > { %1858 = vmatpush.msra.mxu3 %v1167_v34 }
  0x5d   : > { %607 = vperm.xlu1 %1940, %v287_v5   ;;  %777 = vperm.xlu2 %1941, %v287_v5  }
  0x5e   : > { %947 = vperm.xlu0 %1942, %v287_v5   ;;  %1859 = vmatpush.msk.msrb.mxu3 %vm1235_vm0, %v1185_v31  ;;  %vm936_vm0 = vcmp.lt.s32.totalorder %v278_v45, 150 }
  0x5f   : > { %v2446_v57 = vsel %vm936_vm0, %v1772_v51, 4294967295 }
  0x60   : > { %1860 = vmatpush.msrb.mxu3 %v1184_v33 }
  0x62   : > { %1861 = vmatpush.msrb.mxu3 %v1183_v35 }
  0x65   : > { %1943 = vset.pattern.permute.xlu1 %v2366_v11  ;;  %1944 = vset.pattern.permute.xlu2 %v2369_v12 }
  0x66   : > { %1951 = vset.pattern.permute.xlu0 %v2369_v12 }
  0x6d   : > { %443 = vperm.xlu1 %1943, %v287_v5   ;;  %613 = vperm.xlu2 %1944, %v287_v5  }
  0x6e   : > { %625 = vperm.xlu0 %1951, %v2338_v4  }
  0x75   : > { %1945 = vset.pattern.permute.xlu1 %v2376_v13  ;;  %1946 = vset.pattern.permute.xlu2 %v2379_v14 }
  0x76   : > { %1956 = vset.pattern.permute.xlu0 %v2354_v8 }
  0x7d   : > { %783 = vperm.xlu1 %1945, %v287_v5   ;;  %953 = vperm.xlu2 %1946, %v287_v5  }
  0x7e   : > { %655 = vperm.xlu0 %1956, %v2385_v15  }
  0x85   : > { %1947 = vset.pattern.permute.xlu1 %v2354_v8  ;;  %1948 = vset.pattern.permute.xlu2 %v2357_v9 }
  0x86   : > { %1973 = vset.pattern.permute.xlu0 %v2376_v13 }
  0x8d   : > { %619 = vperm.xlu1 %1947, %v2338_v4   ;;  %789 = vperm.xlu2 %1948, %v2338_v4  }
  0x8e   : > { %807 = vperm.xlu0 %1973, %v2335_v3  }
  0x95   : > { %1949 = vset.pattern.permute.xlu1 %v2360_v10  ;;  %1950 = vset.pattern.permute.xlu2 %v2366_v11 }
  0x96   : > { %1974 = vset.pattern.permute.xlu0 %v2344_v6 }
  0x97   : > { %v2412_v37 = vpop.permute.xlu2 %318 }
  0x9d   : > { %959 = vperm.xlu1 %1949, %v2338_v4   ;;  %455 = vperm.xlu2 %1950, %v2338_v4  }
  0x9e   : > { %449 = vperm.xlu0 %1974, %v2338_v4  }
  0xa5   : > { %1952 = vset.pattern.permute.xlu1 %v2376_v13  ;;  %1953 = vset.pattern.permute.xlu2 %v2379_v14 }
  0xa6   : > { %497 = vperm.xlu0 %1974, %v2405_v29  }
  0xa7   : > { %v438_v41 = vpop.permute.xlu2 %437 }
  0xa8   : > { %vm529_vm12 = vcmp.eq.s32.totalorder %v438_v41, %v2431_v46  ;;  %vm530_vm15 = vcmp.eq.s32.totalorder %v438_v41, 4294967295  ;;  %v2984_v41 = vmov 0 }
  0xad   : > { %795 = vperm.xlu1 %1952, %v2338_v4   ;;  %965 = vperm.xlu2 %1953, %v2338_v4   ;;  %v2470_v4 = vperm.slane %v2332_v2, 7 }
  0xae   : > { %1979 = vset.pattern.permute.xlu0 %v2357_v9 }
  0xaf   : > { %v2416_v38 = vpop.permute.xlu1 %305 }
  0xb0   : > { %v293_v36 = vpop.permute.xlu0 %292 }
  0xb1   : > { %vm391_vm11 = vcmp.eq.s32.totalorder %v293_v36, %v2433_v49  ;;  %vm392_vm14 = vcmp.eq.s32.totalorder %v293_v36, 4294967295 }
  0xb2   : > { %vm561_vm1 = vmor %vm391_vm11, %vm529_vm12 }
  0xb3   : > { %vm562_vm2 = vmor %vm392_vm14, %vm530_vm15  ;;  %vm2974_vm14 = vcmask 179200  }
  0xb5   : > { %1954 = vset.pattern.permute.xlu1 %v2327_v1  ;;  %1955 = vset.pattern.permute.xlu2 %v2344_v6 }
  0xb6   : > { %801 = vperm.xlu0 %1979, %v2335_v3  }
  0xb7   : > { %v778_v53 = vpop.permute.xlu2 %777 }
  0xb8   : > { %vm870_vm5 = vcmp.eq.s32.totalorder %v778_v53, 4294967295  ;;  %vm869_vm7 = vcmp.eq.s32.totalorder %v778_v53, %v2441_v54 }
  0xbd   : > { %344 = vperm.xlu1 %1954, %v2385_v15   ;;  %485 = vperm.xlu2 %1955, %v2385_v15  }
  0xbe   : > { %813 = vperm.xlu0 %1979, %v2424_v42  }
  0xbf   : > { %v2428_v44 = vpop.permute.xlu1 %311 }
  0xc0   : > { %v2426_v43 = vpop.permute.xlu0 %298 }
  0xc1   : > { %vm393_vm0 = vcmp.eq.s32.totalorder %v2426_v43, %v2433_v49 }
  0xc5   : > { %1957 = vset.pattern.permute.xlu1 %v2357_v9  ;;  %1958 = vset.pattern.permute.xlu2 %v2360_v10 }
  0xc6   : > { %849 = vperm.xlu0 %1979, %v2450_v59  }
  0xc7   : > { %v614_v63 = vpop.permute.xlu2 %613 }
  0xcd   : > { %825 = vperm.xlu1 %1957, %v2385_v15   ;;  %995 = vperm.xlu2 %1958, %v2385_v15  }
  0xce   : > { %1992 = vset.pattern.permute.xlu0 %v2366_v11 }
  0xcf   : > { %v608_v55 = vpop.permute.xlu1 %607 }
  0xd0   : > { %vm699_vm3 = vcmp.eq.s32.totalorder %v608_v55, %v2439_v52  ;;  %vm700_vm4 = vcmp.eq.s32.totalorder %v608_v55, 4294967295  ;;  %v948_v58 = vpop.permute.xlu0 %947 }
  0xd1   : > { %vm731_vm6 = vmor %vm561_vm1, %vm699_vm3  ;;  %vm1039_vm9 = vcmp.eq.s32.totalorder %v948_v58, %v2443_v56  ;;  %vm1040_vm11 = vcmp.eq.s32.totalorder %v948_v58, %v2446_v57 }
  0xd2   : > { %vm732_vm8 = vmor %vm562_vm2, %vm700_vm4  ;;  %vm394_vm2 = vcmp.eq.s32.totalorder %v2426_v43, 4294967295 }
  0xd3   : > { %vm902_vm10 = vmor %vm732_vm8, %vm870_vm5  ;;  %vm701_vm5 = vcmp.eq.s32.totalorder %v614_v63, %v2439_v52 }
  0xd4   : > { %vm901_vm12 = vmor %vm731_vm6, %vm869_vm7  ;;  %vm702_vm7 = vcmp.eq.s32.totalorder %v614_v63, 4294967295 }
  0xd5   : > { %1959 = vset.pattern.permute.xlu1 %v2344_v6  ;;  %vm1071_vm13 = vmor %vm901_vm12, %vm1039_vm9  ;;  %1960 = vset.pattern.permute.xlu2 %v2354_v8 }
  0xd6   : > { %v1773_v61 = vsel %vm1071_vm13, 1.0, %v2181_v60  ;;  %vm1072_vm15 = vmor %vm902_vm10, %vm1040_vm11  ;;  %491 = vperm.xlu0 %1992, %v2385_v15  }
  0xd7   : > { %1255 = vmatmul.f32.vlgmr.msra.gmra.mxu0 %v1773_v61  ;;  %v1774_v62 = vsel %vm1072_vm15, 1.0, %v2181_v60  ;;  %v954_v5 = vpop.permute.xlu2 %953 }
  0xd8   : > { %1806 = vmatmul.msk.f32.vlgmr.msra.gmra.mxu1 %vm2974_vm14, %v1774_v62  ;;  %vm1041_vm10 = vcmp.eq.s32.totalorder %v954_v5, %v2443_v56  ;;  %vm1042_vm13 = vcmp.eq.s32.totalorder %v954_v5, %v2446_v57 }
  0xdd   : > { %461 = vperm.xlu1 %1959, %v2335_v3   ;;  %631 = vperm.xlu2 %1960, %v2335_v3  }
  0xde   : > { %479 = vperm.xlu0 %1992, %v2424_v42  }
  0xdf   : > { %v444_v0 = vpop.permute.xlu1 %443 }
  0xe0   : > { %vm531_vm1 = vcmp.eq.s32.totalorder %v444_v0, %v2431_v46  ;;  %vm532_vm3 = vcmp.eq.s32.totalorder %v444_v0, 4294967295  ;;  %v2480_v2 = vpop.permute.xlu0 %625 }
  0xe1   : > { %vm563_vm4 = vmor %vm393_vm0, %vm531_vm1 }
  0xe2   : > { %vm564_vm6 = vmor %vm394_vm2, %vm532_vm3  ;;  %vm395_vm3 = vcmp.eq.s32.totalorder %v2416_v38, %v2433_v49 }
  0xe3   : > { %vm733_vm8 = vmor %vm563_vm4, %vm701_vm5 }
  0xe4   : > { %vm734_vm9 = vmor %vm564_vm6, %vm702_vm7  ;;  %vm396_vm6 = vcmp.eq.s32.totalorder %v2416_v38, 4294967295 }
  0xe5   : > { %1961 = vset.pattern.permute.xlu1 %v2347_v7  ;;  %1962 = vset.pattern.permute.xlu2 %v2366_v11 }
  0xe6   : > { %1994 = vset.pattern.permute.xlu0 %v2379_v14 }
  0xe7   : > { %v790_v21 = vpop.permute.xlu2 %789 }
  0xed   : > { %389 = vperm.xlu1 %1961, %v2470_v4   ;;  %527 = vperm.xlu2 %1962, %v2470_v4  }
  0xee   : > { %1037 = vperm.xlu0 %1994, %v2470_v4  }
  0xef   : > { %v784_v16 = vpop.permute.xlu1 %783 }
  0xf0   : > { %vm871_vm11 = vcmp.eq.s32.totalorder %v784_v16, %v2441_v54  ;;  %vm872_vm12 = vcmp.eq.s32.totalorder %v784_v16, 4294967295  ;;  %v2489_v19 = vpop.permute.xlu0 %655 }
  0xf1   : > { %vm904_vm15 = vmor %vm734_vm9, %vm872_vm12  ;;  %vm873_vm12 = vcmp.eq.s32.totalorder %v790_v21, %v2441_v54 }
  0xf2   : > { %vm903_vm0 = vmor %vm733_vm8, %vm871_vm11 }
  0xf3   : > { %vm1073_vm1 = vmor %vm903_vm0, %vm1041_vm10 }
  0xf4   : > { %v1775_v17 = vsel %vm1073_vm1, 1.0, %v2181_v60  ;;  %vm1074_vm2 = vmor %vm904_vm15, %vm1042_vm13  ;;  %vm874_vm1 = vcmp.eq.s32.totalorder %v790_v21, 4294967295 }
  0xf5   : > { %1258 = vmatmul.f32.gmra.mxu0 %v1775_v17  ;;  %v1776_v18 = vsel %vm1074_vm2, 1.0, %v2181_v60  ;;  %1963 = vset.pattern.permute.xlu1 %v2360_v10 }
  0xf6   : > { %1807 = vmatmul.msk.f32.gmra.mxu1 %vm2974_vm14, %v1776_v18  ;;  %1964 = vset.pattern.permute.xlu2 %v2347_v7 }
  0xf7   : > { %1013 = vperm.xlu0 %1994, %v2405_v29   ;;  %v456_v25 = vpop.permute.xlu2 %455 }
  0xfd   : > { %971 = vperm.xlu1 %1963, %v2335_v3  }
  0xfe   : > { %350 = vperm.xlu2 %1964, %v2385_v15  }
  0xff   : > { %v620_v22 = vpop.permute.xlu1 %619  ;;  %989 = vperm.xlu0 %1994, %v2424_v42  }
 0x100   : > { %v2496_v20 = vpop.permute.xlu0 %807  ;;  %vm704_vm8 = vcmp.eq.s32.totalorder %v620_v22, 4294967295  ;;  %vm703_vm10 = vcmp.eq.s32.totalorder %v620_v22, %v2439_v52 }
 0x105   : > { %1965 = vset.pattern.permute.xlu1 %v2369_v12 }
 0x106   : > { %1966 = vset.pattern.permute.xlu2 %v2369_v12 }
 0x107   : > { %2003 = vset.pattern.permute.xlu0 %v2344_v6  ;;  %v966_v28 = vpop.permute.xlu2 %965 }
 0x10d   : > { %697 = vperm.xlu1 %1965, %v2470_v4  }
 0x10e   : > { %661 = vperm.xlu2 %1966, %v2385_v15  }
 0x10f   : > { %v960_v24 = vpop.permute.xlu1 %959  ;;  %521 = vperm.xlu0 %2003, %v2470_v4  }
 0x110   : > { %v450_v23 = vpop.permute.xlu0 %449  ;;  %vm1043_vm15 = vcmp.eq.s32.totalorder %v960_v24, %v2443_v56 }
 0x111   : > { %vm533_vm4 = vcmp.eq.s32.totalorder %v450_v23, %v2431_v46  ;;  %vm534_vm5 = vcmp.eq.s32.totalorder %v450_v23, 4294967295 }
 0x112   : > { %vm565_vm7 = vmor %vm395_vm3, %vm533_vm4  ;;  %vm1044_vm3 = vcmp.eq.s32.totalorder %v960_v24, %v2446_v57 }
 0x113   : > { %vm566_vm9 = vmor %vm396_vm6, %vm534_vm5  ;;  %vm535_vm5 = vcmp.eq.s32.totalorder %v456_v25, %v2431_v46 }
 0x114   : > { %vm736_vm11 = vmor %vm566_vm9, %vm704_vm8  ;;  %vm536_vm8 = vcmp.eq.s32.totalorder %v456_v25, 4294967295  ;;  %vm398_vm9 = vcmp.eq.s32.totalorder %v2428_v44, 4294967295 }
 0x115   : > { %1967 = vset.pattern.permute.xlu1 %v2376_v13  ;;  %vm735_vm13 = vmor %vm565_vm7, %vm703_vm10  ;;  %vm397_vm7 = vcmp.eq.s32.totalorder %v2428_v44, %v2433_v49 }
 0x116   : > { %1968 = vset.pattern.permute.xlu2 %v2376_v13  ;;  %vm905_vm0 = vmor %vm735_vm13, %vm873_vm12  ;;  %vm706_vm13 = vcmp.eq.s32.totalorder %v2480_v2, 4294967295 }
 0x117   : > { %vm1075_vm2 = vmor %vm905_vm0, %vm1043_vm15  ;;  %2007 = vset.pattern.permute.xlu0 %v2379_v14  ;;  %v486_v33 = vpop.permute.xlu2 %485 }
 0x118   : > { %v1777_v26 = vsel %vm1075_vm2, 1.0, %v2181_v60  ;;  %vm906_vm4 = vmor %vm736_vm11, %vm874_vm1  ;;  %vm705_vm11 = vcmp.eq.s32.totalorder %v2480_v2, %v2439_v52  ;;  %v2542_v36 = vpop.permute.xlu0 %497 }
 0x119   : > { %1261 = vmatmul.f32.gmra.mxu0 %v1777_v26  ;;  %vm1076_vm6 = vmor %vm906_vm4, %vm1044_vm3  ;;  %vm1045_vm3 = vcmp.eq.s32.totalorder %v966_v28, %v2443_v56 }
 0x11a   : > { %v1778_v27 = vsel %vm1076_vm6, 1.0, %v2181_v60  ;;  %vm567_vm10 = vmor %vm397_vm7, %vm535_vm5  ;;  %vm1046_vm5 = vcmp.eq.s32.totalorder %v966_v28, %v2446_v57 }
 0x11b   : > { %1808 = vmatmul.msk.f32.gmra.mxu1 %vm2974_vm14, %v1778_v27  ;;  %vm568_vm12 = vmor %vm398_vm9, %vm536_vm8  ;;  %vm546_vm9 = vcmp.eq.s32.totalorder %v486_v33, 4294967295 }
 0x11c   : > { %vm737_vm15 = vmor %vm567_vm10, %vm705_vm11  ;;  %vm716_vm10 = vcmp.eq.s32.totalorder %v2489_v19, 4294967295 }
 0x11d   : > { %867 = vperm.xlu1 %1967, %v2470_v4   ;;  %vm738_vm0 = vmor %vm568_vm12, %vm706_vm13 }
 0x11e   : > { %831 = vperm.xlu2 %1968, %v2385_v15  }
 0x11f   : > { %v796_v30 = vpop.permute.xlu1 %795 }
 0x120   : > { %vm875_vm1 = vcmp.eq.s32.totalorder %v796_v30, %v2441_v54  ;;  %vm876_vm2 = vcmp.eq.s32.totalorder %v796_v30, 4294967295  ;;  %v2997_v30 = vmov 0 }
 0x121   : > { %vm908_vm4 = vmor %vm738_vm0, %vm876_vm2  ;;  %vm545_vm0 = vcmp.eq.s32.totalorder %v486_v33, %v2431_v46 }
 0x122   : > { %vm907_vm6 = vmor %vm737_vm15, %vm875_vm1  ;;  %vm715_vm1 = vcmp.eq.s32.totalorder %v2489_v19, %v2439_v52 }
 0x123   : > { %vm1077_vm8 = vmor %vm907_vm6, %vm1045_vm3 }
 0x124   : > { %v1779_v31 = vsel %vm1077_vm8, 1.0, %v2181_v60  ;;  %vm1078_vm7 = vmor %vm908_vm4, %vm1046_vm5 }
 0x125   : > { %1264 = vmatmul.f32.gmra.mxu0 %v1779_v31  ;;  %v1780_v32 = vsel %vm1078_vm7, 1.0, %v2181_v60  ;;  %1969 = vset.pattern.permute.xlu1 %v2379_v14 }
 0x126   : > { %1809 = vmatmul.msk.f32.gmra.mxu1 %vm2974_vm14, %v1780_v32  ;;  %1970 = vset.pattern.permute.xlu2 %v2347_v7 }
 0x128   : > { %v802_v39 = vpop.permute.xlu0 %801 }
 0x12d   : > { %1001 = vperm.xlu1 %1969, %v2385_v15   ;;  %v996_v15 = vpop.permute.xlu2 %995 }
 0x12e   : > { %324 = vperm.xlu2 %1970, %v2335_v3   ;;  %vm1055_vm5 = vcmp.eq.s32.totalorder %v996_v15, %v2443_v56  ;;  %vm1056_vm7 = vcmp.eq.s32.totalorder %v996_v15, %v2446_v57 }
 0x12f   : > { %v345_v34 = vpop.permute.xlu1 %344 }
 0x130   : > { %vm408_vm11 = vcmp.eq.s32.totalorder %v345_v34, 4294967295  ;;  %vm407_vm15 = vcmp.eq.s32.totalorder %v345_v34, %v2433_v49  ;;  %v2563_v43 = vpop.permute.xlu0 %813  ;;  %v2999_v34 = vmov 0 }
 0x131   : > { %vm578_vm12 = vmor %vm408_vm11, %vm546_vm9 }
 0x132   : > { %vm2537_vm13 = vmor %vm578_vm12, %vm716_vm10 }
 0x133   : > { %vm577_vm2 = vmor %vm407_vm15, %vm545_vm0 }
 0x134   : > { %vm747_vm6 = vmor %vm577_vm2, %vm715_vm1 }
 0x135   : > { %1971 = vset.pattern.permute.xlu1 %v2366_v11 }
 0x136   : > { %1972 = vset.pattern.permute.xlu2 %v2369_v12 }
 0x137   : > { %v632_v44 = vpop.permute.xlu2 %631 }
 0x138   : > { %v2569_v47 = vpop.permute.xlu0 %849 }
 0x13d   : > { %467 = vperm.xlu1 %1971, %v2335_v3  }
 0x13e   : > { %637 = vperm.xlu2 %1972, %v2335_v3  }
 0x13f   : > { %v826_v38 = vpop.permute.xlu1 %825 }
 0x140   : > { %vm885_vm3 = vcmp.eq.s32.totalorder %v826_v38, %v2441_v54  ;;  %vm886_vm4 = vcmp.eq.s32.totalorder %v826_v38, 4294967295 }
 0x141   : > { %vm918_vm8 = vmor %vm2537_vm13, %vm886_vm4 }
 0x142   : > { %vm917_vm9 = vmor %vm747_vm6, %vm885_vm3  ;;  %vm400_vm6 = vcmp.eq.s32.totalorder %v2412_v37, 4294967295 }
 0x143   : > { %vm1087_vm10 = vmor %vm917_vm9, %vm1055_vm5  ;;  %vm399_vm5 = vcmp.eq.s32.totalorder %v2412_v37, %v2433_v49  ;;  %vm708_vm9 = vcmp.eq.s32.totalorder %v632_v44, 4294967295 }
 0x144   : > { %v1789_v40 = vsel %vm1087_vm10, 1.0, %v2181_v60  ;;  %vm2557_vm11 = vmor %vm918_vm8, %vm1056_vm7 }
 0x145   : > { %v2985_v41 = vsel %vm2557_vm11, 4294967295, %v2984_v41  ;;  %1279 = vmatmul.f32.vlgmr.msra.gmra.mxu2 %v1789_v40  ;;  %1975 = vset.pattern.permute.xlu1 %v2347_v7 }
 0x146   : > { %1976 = vset.pattern.permute.xlu2 %v2366_v11 }
 0x147   : > { %v2567_v45 = vpop.permute.xlu2 %527 }
 0x148   : > { %v2576_v51 = vpop.permute.xlu0 %491  ;;  %vm560_vm0 = vcmp.eq.s32.totalorder %v2567_v45, 4294967295 }
 0x149   : > { %vm548_vm13 = vcmp.eq.s32.totalorder %v2576_v51, 4294967295 }
 0x14d   : > { %363 = vperm.xlu1 %1975, %v2405_v29  }
 0x14e   : > { %503 = vperm.xlu2 %1976, %v2405_v29  }
 0x14f   : > { %v462_v48 = vpop.permute.xlu1 %461 }
 0x150   : > { %vm537_vm3 = vcmp.eq.s32.totalorder %v462_v48, %v2431_v46  ;;  %vm538_vm4 = vcmp.eq.s32.totalorder %v462_v48, 4294967295  ;;  %v2635_v26 = vpop.permute.xlu0 %479 }
 0x151   : > { %vm569_vm8 = vmor %vm399_vm5, %vm537_vm3  ;;  %vm877_vm3 = vcmp.eq.s32.totalorder %v802_v39, %v2441_v54 }
 0x152   : > { %vm570_vm7 = vmor %vm400_vm6, %vm538_vm4 }
 0x154   : > { %v1256_v61 = vpop.f32.mrf.mxu0 }
 0x155   : > { %1977 = vset.pattern.permute.xlu1 %v2379_v14  ;;  %v1321_v63 = vpop.f32.mrf.mxu1 }
 0x156   : > { %1978 = vset.pattern.permute.xlu2 %v2327_v1  ;;  %v1322_v18 = vadd.f32 %v1321_v63, %v1256_v61 }
 0x158   : > { %v2573_v50 = vpop.permute.xlu2 %350 }
 0x159   : > { %vm410_vm12 = vcmp.eq.s32.totalorder %v2573_v50, 4294967295 }
 0x15a   : > { %vm2581_vm15 = vmor %vm410_vm12, %vm548_vm13  ;;  %vm707_vm12 = vcmp.eq.s32.totalorder %v632_v44, %v2439_v52 }
 0x15b   : > { %vm739_vm14 = vmor %vm569_vm8, %vm707_vm12  ;;  %vm2975_vm8 = vcmp.lt.s32.totalorder %v2347_v7, 12 }
 0x15d   : > { %977 = vperm.xlu1 %1977, %v2335_v3  }
 0x15e   : > { %357 = vperm.xlu2 %1978, %v2405_v29  }
 0x15f   : > { %v390_v55 = vpop.permute.xlu1 %389 }
 0x160   : > { %vm422_vm1 = vcmp.eq.s32.totalorder %v390_v55, 4294967295  ;;  %v2644_v27 = vpop.permute.xlu0 %1037 }
 0x161   : > { %vm2586_vm2 = vmor %vm422_vm1, %vm560_vm0  ;;  %vm878_vm1 = vcmp.eq.s32.totalorder %v802_v39, 4294967295 }
 0x162   : > { %vm740_vm0 = vmor %vm570_vm7, %vm708_vm9  ;;  %vm2992_vm9 = vcmask 179200  }
 0x163   : > { %vm910_vm4 = vmor %vm740_vm0, %vm878_vm1 }
 0x165   : > { %1980 = vset.pattern.permute.xlu1 %v2369_v12 }
 0x166   : > { %1981 = vset.pattern.permute.xlu2 %v2354_v8 }
 0x168   : > { %v2596_v3 = vpop.permute.xlu2 %661 }
 0x169   : > { %vm718_vm10 = vcmp.eq.s32.totalorder %v2596_v3, 4294967295  ;;  %v1014_v58 = vpop.permute.xlu0 %1013 }
 0x16a   : > { %vm2602_vm13 = vmor %vm2581_vm15, %vm718_vm10 }
 0x16b   : > { %vm909_vm15 = vmor %vm739_vm14, %vm877_vm3  ;;  %vm559_vm3 = vcmp.eq.s32.totalorder %v2567_v45, %v2431_v46 }
 0x16d   : > { %673 = vperm.xlu1 %1980, %v2405_v29  }
 0x16e   : > { %667 = vperm.xlu2 %1981, %v2405_v29  }
 0x16f   : > { %v972_v37 = vpop.permute.xlu1 %971 }
 0x170   : > { %vm1047_vm5 = vcmp.eq.s32.totalorder %v972_v37, %v2443_v56  ;;  %vm1048_vm6 = vcmp.eq.s32.totalorder %v972_v37, %v2446_v57 }
 0x171   : > { %vm1079_vm10 = vmor %vm909_vm15, %vm1047_vm5 }
 0x172   : > { %v1259_v0 = vpop.f32.mrf.mxu0  ;;  %v1781_v5 = vsel %vm1079_vm10, 1.0, %v2181_v60  ;;  %vm1080_vm7 = vmor %vm910_vm4, %vm1048_vm6  ;;  %vm1069_vm10 = vcmp.eq.s32.totalorder %v2644_v27, %v2443_v56 }
 0x173   : > { %v1324_v16 = vpop.f32.mrf.mxu1  ;;  %1267 = vmatmul.f32.gmra.mxu0 %v1781_v5  ;;  %v1782_v2 = vsel %vm1080_vm7, 1.0, %v2181_v60 }
 0x174   : > { %v1325_v17 = vadd.f32 %v1324_v16, %v1259_v0  ;;  %1810 = vmatmul.msk.f32.gmra.mxu1 %vm2992_vm9, %v1782_v2  ;;  %v990_v16 = vpop.permute.xlu0 %989 }
 0x175   : > { %1982 = vset.pattern.permute.xlu1 %v2376_v13 }
 0x176   : > { %v1379_v19 = vsel %vm2975_vm8, %v1325_v17, -inf  ;;  %1983 = vset.pattern.permute.xlu2 %v2357_v9 }
 0x177   : > { %v2619_v21 = vmax.f32 %v1322_v18, %v1379_v19 }
 0x178   : > { %v832_v22 = vpop.permute.xlu2 %831 }
 0x179   : > { %vm888_vm14 = vcmp.eq.s32.totalorder %v832_v22, 4294967295 }
 0x17a   : > { %vm2623_vm12 = vmor %vm2602_vm13, %vm888_vm14  ;;  %vm421_vm13 = vcmp.eq.s32.totalorder %v390_v55, %v2433_v49 }
 0x17d   : > { %843 = vperm.xlu1 %1982, %v2405_v29  }
 0x17e   : > { %837 = vperm.xlu2 %1983, %v2405_v29  }
 0x17f   : > { %v698_v24 = vpop.permute.xlu1 %697 }
 0x180   : > { %vm730_vm0 = vcmp.eq.s32.totalorder %v698_v24, 4294967295  ;;  %vm729_vm4 = vcmp.eq.s32.totalorder %v698_v24, %v2439_v52 }
 0x181   : > { %vm2631_vm1 = vmor %vm2586_vm2, %vm730_vm0  ;;  %vm409_vm0 = vcmp.eq.s32.totalorder %v2573_v50, %v2433_v49 }
 0x182   : > { %vm591_vm2 = vmor %vm421_vm13, %vm559_vm3  ;;  %vm547_vm13 = vcmp.eq.s32.totalorder %v2576_v51, %v2431_v46 }
 0x183   : > { %vm761_vm5 = vmor %vm591_vm2, %vm729_vm4  ;;  %vm887_vm4 = vcmp.eq.s32.totalorder %v832_v22, %v2441_v54 }
 0x184   : > { %vm579_vm3 = vmor %vm409_vm0, %vm547_vm13 }
 0x185   : > { %1984 = vset.pattern.permute.xlu1 %v2360_v10 }
 0x186   : > { %1985 = vset.pattern.permute.xlu2 %v2327_v1 }
 0x188   : > { %v325_v31 = vpop.permute.xlu2 %324 }
 0x18d   : > { %1007 = vperm.xlu1 %1984, %v2405_v29  }
 0x18e   : > { %331 = vperm.xlu2 %1985, %v2424_v42  }
 0x18f   : > { %v868_v28 = vpop.permute.xlu1 %867 }
 0x190   : > { %vm899_vm6 = vcmp.eq.s32.totalorder %v868_v28, %v2441_v54  ;;  %vm900_vm15 = vcmp.eq.s32.totalorder %v868_v28, 4294967295 }
 0x191   : > { %vm2652_vm7 = vmor %vm2631_vm1, %vm900_vm15  ;;  %vm717_vm1 = vcmp.eq.s32.totalorder %v2596_v3, %v2439_v52 }
 0x192   : > { %v2998_v30 = vsel %vm2652_vm7, 4294967295, %v2997_v30  ;;  %vm931_vm9 = vmor %vm761_vm5, %vm899_vm6  ;;  %vm880_vm7 = vcmp.eq.s32.totalorder %v2496_v20, 4294967295 }
 0x193   : > { %vm1101_vm14 = vmor %vm931_vm9, %vm1069_vm10 }
 0x194   : > { %v1803_v29 = vsel %vm1101_vm14, 1.0, %v2181_v60  ;;  %vm749_vm2 = vmor %vm579_vm3, %vm717_vm1  ;;  %vm401_vm3 = vcmp.eq.s32.totalorder %v325_v31, %v2433_v49 }
 0x195   : > { %1300 = vmatmul.f32.vlgmr.msra.gmra.mxu3 %v1803_v29  ;;  %1986 = vset.pattern.permute.xlu1 %v2344_v6  ;;  %vm919_vm15 = vmor %vm749_vm2, %vm887_vm4  ;;  %vm402_vm4 = vcmp.eq.s32.totalorder %v325_v31, 4294967295 }
 0x196   : > { %1987 = vset.pattern.permute.xlu2 %v2354_v8  ;;  %v1262_v39 = vpop.f32.mrf.mxu0 }
 0x198   : > { %v638_v35 = vpop.permute.xlu2 %637 }
 0x19d   : > { %473 = vperm.xlu1 %1986, %v2424_v42  }
 0x19e   : > { %643 = vperm.xlu2 %1987, %v2424_v42  }
 0x19f   : > { %v1002_v32 = vpop.permute.xlu1 %1001 }
 0x1a0   : > { %vm1057_vm5 = vcmp.eq.s32.totalorder %v1002_v32, %v2443_v56  ;;  %vm1058_vm6 = vcmp.eq.s32.totalorder %v1002_v32, %v2446_v57  ;;  %v522_v32 = vpop.permute.xlu0 %521 }
 0x1a1   : > { %vm1089_vm10 = vmor %vm919_vm15, %vm1057_vm5  ;;  %vm709_vm5 = vcmp.eq.s32.totalorder %v638_v35, %v2439_v52 }
 0x1a2   : > { %v1791_v33 = vsel %vm1089_vm10, 1.0, %v2181_v60  ;;  %vm2673_vm9 = vmor %vm2623_vm12, %vm1058_vm6  ;;  %vm550_vm12 = vcmp.eq.s32.totalorder %v2542_v36, 4294967295  ;;  %vm710_vm10 = vcmp.eq.s32.totalorder %v638_v35, 4294967295 }
 0x1a3   : > { %v3000_v34 = vsel %vm2673_vm9, 4294967295, %v2999_v34  ;;  %1282 = vmatmul.f32.gmra.mxu2 %v1791_v33 }
 0x1a5   : > { %1988 = vset.pattern.permute.xlu1 %v2327_v1 }
 0x1a6   : > { %1989 = vset.pattern.permute.xlu2 %v2344_v6 }
 0x1a8   : > { %v2681_v15 = vpop.permute.xlu2 %503 }
 0x1ad   : > { %370 = vperm.xlu1 %1988, %v2450_v59  }
 0x1ae   : > { %509 = vperm.xlu2 %1989, %v2450_v59  }
 0x1af   : > { %v468_v6 = vpop.permute.xlu1 %467 }
 0x1b0   : > { %vm539_vm13 = vcmp.eq.s32.totalorder %v468_v6, %v2431_v46  ;;  %vm540_vm1 = vcmp.eq.s32.totalorder %v468_v6, 4294967295 }
 0x1b1   : > { %vm571_vm2 = vmor %vm401_vm3, %vm539_vm13 }
 0x1b2   : > { %vm572_vm15 = vmor %vm402_vm4, %vm540_vm1 }
 0x1b3   : > { %vm741_vm8 = vmor %vm571_vm2, %vm709_vm5  ;;  %vm3005_vm2 = vcmask 179200  }
 0x1b4   : > { %vm742_vm9 = vmor %vm572_vm15, %vm710_vm10 }
 0x1b5   : > { %1990 = vset.pattern.permute.xlu1 %v2360_v10  ;;  %vm912_vm3 = vmor %vm742_vm9, %vm880_vm7  ;;  %vm552_vm9 = vcmp.eq.s32.totalorder %v2681_v15, 4294967295 }
 0x1b6   : > { %1991 = vset.pattern.permute.xlu2 %v2354_v8 }
 0x1b8   : > { %v2686_v38 = vpop.permute.xlu2 %357 }
 0x1b9   : > { %vm412_vm14 = vcmp.eq.s32.totalorder %v2686_v38, 4294967295 }
 0x1ba   : > { %vm2689_vm0 = vmor %vm412_vm14, %vm550_vm12  ;;  %vm879_vm14 = vcmp.eq.s32.totalorder %v2496_v20, %v2441_v54 }
 0x1bb   : > { %vm911_vm13 = vmor %vm741_vm8, %vm879_vm14 }
 0x1bd   : > { %983 = vperm.xlu1 %1990, %v2424_v42  }
 0x1be   : > { %679 = vperm.xlu2 %1991, %v2450_v59  }
 0x1bf   : > { %v2698_v40 = vpop.permute.xlu1 %363 }
 0x1c0   : > { %vm414_vm7 = vcmp.eq.s32.totalorder %v2698_v40, 4294967295 }
 0x1c1   : > { %vm584_vm10 = vmor %vm414_vm7, %vm552_vm9  ;;  %vm413_vm7 = vcmp.eq.s32.totalorder %v2698_v40, %v2433_v49  ;;  %vm551_vm9 = vcmp.eq.s32.totalorder %v2681_v15, %v2431_v46 }
 0x1c5   : > { %1019 = vperm.xlu1 %1990, %v2450_v59  }
 0x1c6   : > { %1993 = vset.pattern.permute.xlu2 %v2347_v7 }
 0x1c8   : > { %v668_v44 = vpop.permute.xlu2 %667  ;;  %v1280_v6 = vpop.f32.mrf.mxu2 }
 0x1c9   : > { %vm720_vm6 = vcmp.eq.s32.totalorder %v668_v44, 4294967295 }
 0x1ca   : > { %vm2704_vm12 = vmor %vm2689_vm0, %vm720_vm6 }
 0x1cd   : > { %1995 = vset.pattern.permute.xlu1 %v2369_v12 }
 0x1ce   : > { %337 = vperm.xlu2 %1993, %v2424_v42  }
 0x1cf   : > { %v978_v48 = vpop.permute.xlu1 %977 }
 0x1d0   : > { %vm1049_vm1 = vcmp.eq.s32.totalorder %v978_v48, %v2443_v56  ;;  %vm1050_vm0 = vcmp.eq.s32.totalorder %v978_v48, %v2446_v57 }
 0x1d1   : > { %vm1081_vm4 = vmor %vm911_vm13, %vm1049_vm1 }
 0x1d2   : > { %v1783_v50 = vsel %vm1081_vm4, 1.0, %v2181_v60  ;;  %vm1082_vm6 = vmor %vm912_vm3, %vm1050_vm0  ;;  %vm549_vm4 = vcmp.eq.s32.totalorder %v2542_v36, %v2431_v46 }
 0x1d3   : > { %1270 = vmatmul.f32.gmra.mxu0 %v1783_v50  ;;  %v1784_v51 = vsel %vm1082_vm6, 1.0, %v2181_v60  ;;  %vm3008_vm3 = vmmov %vm3005_vm2  ;;  %vm411_vm6 = vcmp.eq.s32.totalorder %v2686_v38, %v2433_v49  ;;  %v1501_v50 = vld [vmem:[#allocation7 + $0xf8] sm:$0xff] }
 0x1d4   : > { %1811 = vmatmul.msk.f32.gmra.mxu1 %vm3005_vm2, %v1784_v51  ;;  %vm581_vm2 = vmor %vm411_vm6, %vm549_vm4  ;;  %1558 = vmatpush.msra.mxu3 %v1501_v50  ;;  %v1482_v50 = vld [vmem:[#allocation7 + $0x60] sm:$0xff] }
 0x1d5   : > { %649 = vperm.xlu1 %1995, %v2424_v42  }
 0x1d6   : > { %1996 = vset.pattern.permute.xlu2 %v2376_v13 }
 0x1d8   : > { %v838_v20 = vpop.permute.xlu2 %837 }
 0x1d9   : > { %vm890_vm8 = vcmp.eq.s32.totalorder %v838_v20, 4294967295 }
 0x1da   : > { %vm2722_vm5 = vmor %vm2704_vm12, %vm890_vm8  ;;  %vm1062_vm12 = vcmp.eq.s32.totalorder %v1014_v58, %v2446_v57  ;;  %vm719_vm8 = vcmp.eq.s32.totalorder %v668_v44, %v2439_v52  ;;  %v1265_v44 = vpop.f32.mrf.mxu0 }
 0x1dd   : > { %1997 = vset.pattern.permute.xlu1 %v2347_v7 }
 0x1de   : > { %819 = vperm.xlu2 %1996, %v2424_v42  }
 0x1df   : > { %v674_v55 = vpop.permute.xlu1 %673 }
 0x1e0   : > { %vm722_vm15 = vcmp.eq.s32.totalorder %v674_v55, 4294967295 }
 0x1e1   : > { %vm754_vm14 = vmor %vm584_vm10, %vm722_vm15  ;;  %vm889_vm10 = vcmp.eq.s32.totalorder %v838_v20, %v2441_v54 }
 0x1e2   : > { %vm751_vm15 = vmor %vm581_vm2, %vm719_vm8  ;;  %vm1061_vm8 = vcmp.eq.s32.totalorder %v1014_v58, %v2443_v56 }
 0x1e5   : > { %376 = vperm.xlu1 %1997, %v2450_v59  }
 0x1e6   : > { %1998 = vset.pattern.permute.xlu2 %v2366_v11 }
 0x1e8   : > { %v332_v36 = vpop.permute.xlu2 %331 }
 0x1ed   : > { %1999 = vset.pattern.permute.xlu1 %v2369_v12 }
 0x1ee   : > { %515 = vperm.xlu2 %1998, %v2450_v59  }
 0x1ef   : > { %v844_v3 = vpop.permute.xlu1 %843 }
 0x1f0   : > { %vm892_vm13 = vcmp.eq.s32.totalorder %v844_v3, 4294967295 }
 0x1f1   : > { %vm924_vm1 = vmor %vm754_vm14, %vm892_vm13  ;;  %vm721_vm14 = vcmp.eq.s32.totalorder %v674_v55, %v2439_v52 }
 0x1f2   : > { %vm1094_vm0 = vmor %vm924_vm1, %vm1062_vm12 }
 0x1f3   : > { %v1796_v11 = vsel %vm1094_vm0, 1.0, %v2181_v60  ;;  %vm583_vm12 = vmor %vm413_vm7, %vm551_vm9 }
 0x1f4   : > { %1817 = vmatmul.msk.f32.vlgmr.msrb.gmra.mxu3 %vm3008_vm3, %v1796_v11  ;;  %vm921_vm0 = vmor %vm751_vm15, %vm889_vm10  ;;  %vm891_vm3 = vcmp.eq.s32.totalorder %v844_v3, %v2441_v54  ;;  %vm403_vm10 = vcmp.eq.s32.totalorder %v332_v36, %v2433_v49  ;;  %v1500_v11 = vld [vmem:[#allocation7 + $0xf0] sm:$0xff] }
 0x1f5   : > { %685 = vperm.xlu1 %1999, %v2450_v59   ;;  %vm753_vm2 = vmor %vm583_vm12, %vm721_vm14  ;;  %vm404_vm12 = vcmp.eq.s32.totalorder %v332_v36, 4294967295  ;;  %1538 = vmatpush.msrb.mxu2 %v1500_v11  ;;  %v1496_v36 = vld [vmem:[#allocation7 + $0xd0] sm:$0xff] }
 0x1f6   : > { %2000 = vset.pattern.permute.xlu2 %v2376_v13  ;;  %vm923_vm7 = vmor %vm753_vm2, %vm891_vm3  ;;  %vm881_vm3 = vcmp.eq.s32.totalorder %v2563_v43, %v2441_v54  ;;  %vm882_vm2 = vcmp.eq.s32.totalorder %v2563_v43, 4294967295 }
 0x1f7   : > { %vm1093_vm9 = vmor %vm923_vm7, %vm1061_vm8 }
 0x1f8   : > { %v1795_v42 = vsel %vm1093_vm9, 1.0, %v2181_v60  ;;  %v644_v61 = vpop.permute.xlu2 %643 }
 0x1fd   : > { %2001 = vset.pattern.permute.xlu1 %v2379_v14  ;;  %v3009_v14 = vmov 0 }
 0x1fe   : > { %855 = vperm.xlu2 %2000, %v2450_v59  }
 0x1ff   : > { %v1008_v12 = vpop.permute.xlu1 %1007 }
 0x200   : > { %vm1059_vm13 = vcmp.eq.s32.totalorder %v1008_v12, %v2443_v56  ;;  %vm1060_vm1 = vcmp.eq.s32.totalorder %v1008_v12, %v2446_v57  ;;  %v1495_v12 = vld [vmem:[#allocation7 + $0xc8] sm:$0xff] }
 0x201   : > { %vm1091_vm4 = vmor %vm921_vm0, %vm1059_vm13  ;;  %vm711_vm13 = vcmp.eq.s32.totalorder %v644_v61, %v2439_v52  ;;  %vm712_vm0 = vcmp.eq.s32.totalorder %v644_v61, 4294967295  ;;  %v1491_v61 = vld [vmem:[#allocation7 + $0xa8] sm:$0xff] }
 0x202   : > { %v1793_v13 = vsel %vm1091_vm4, 1.0, %v2181_v60  ;;  %vm2758_vm6 = vmor %vm2722_vm5, %vm1060_vm1 }
 0x203   : > { %v3010_v14 = vsel %vm2758_vm6, 4294967295, %v3009_v14  ;;  %1285 = vmatmul.f32.gmra.mxu2 %v1793_v13  ;;  %v1493_v13 = vld [vmem:[#allocation7 + $0xb8] sm:$0xff] }
 0x205   : > { %1025 = vperm.xlu1 %2001, %v2450_v59  }
 0x206   : > { %2002 = vset.pattern.permute.xlu2 %v2327_v1 }
 0x208   : > { %v510_v1 = vpop.permute.xlu2 %509 }
 0x209   : > { %vm553_vm7 = vcmp.eq.s32.totalorder %v510_v1, %v2431_v46  ;;  %vm554_vm6 = vcmp.eq.s32.totalorder %v510_v1, 4294967295 }
 0x20b   : > { %1288 = vmatmul.f32.gmra.mxu2 %v1795_v42 }
 0x20d   : > { %2004 = vset.pattern.permute.xlu1 %v2354_v8 }
 0x20e   : > { %383 = vperm.xlu2 %2002, %v2470_v4  }
 0x20f   : > { %v474_v59 = vpop.permute.xlu1 %473 }
 0x210   : > { %vm541_vm5 = vcmp.eq.s32.totalorder %v474_v59, %v2431_v46  ;;  %vm542_vm15 = vcmp.eq.s32.totalorder %v474_v59, 4294967295 }
 0x211   : > { %vm573_vm14 = vmor %vm403_vm10, %vm541_vm5 }
 0x212   : > { %vm574_vm1 = vmor %vm404_vm12, %vm542_vm15 }
 0x213   : > { %vm743_vm4 = vmor %vm573_vm14, %vm711_vm13 }
 0x214   : > { %vm744_vm8 = vmor %vm574_vm1, %vm712_vm0 }
 0x215   : > { %691 = vperm.xlu1 %2004, %v2470_v4   ;;  %vm913_vm5 = vmor %vm743_vm4, %vm881_vm3 }
 0x216   : > { %2005 = vset.pattern.permute.xlu2 %v2357_v9  ;;  %vm914_vm10 = vmor %vm744_vm8, %vm882_vm2  ;;  %vm893_vm2 = vcmp.eq.s32.totalorder %v2569_v47, %v2441_v54 }
 0x218   : > { %v680_v9 = vpop.permute.xlu2 %679 }
 0x219   : > { %vm723_vm0 = vcmp.eq.s32.totalorder %v680_v9, %v2439_v52  ;;  %vm724_vm3 = vcmp.eq.s32.totalorder %v680_v9, 4294967295 }
 0x21d   : > { %2006 = vset.pattern.permute.xlu1 %v2360_v10 }
 0x21e   : > { %861 = vperm.xlu2 %2005, %v2470_v4  }
 0x21f   : > { %v371_v8 = vpop.permute.xlu1 %370 }
 0x220   : > { %vm415_vm9 = vcmp.eq.s32.totalorder %v371_v8, %v2433_v49  ;;  %vm416_vm11 = vcmp.eq.s32.totalorder %v371_v8, 4294967295 }
 0x221   : > { %vm585_vm12 = vmor %vm415_vm9, %vm553_vm7  ;;  %vm3011_vm7 = vcmask 179200  }
 0x222   : > { %vm586_vm15 = vmor %vm416_vm11, %vm554_vm6  ;;  %vm894_vm11 = vcmp.eq.s32.totalorder %v2569_v47, 4294967295 }
 0x223   : > { %vm755_vm8 = vmor %vm585_vm12, %vm723_vm0 }
 0x224   : > { %vm756_vm6 = vmor %vm586_vm15, %vm724_vm3  ;;  %vm543_vm15 = vcmp.eq.s32.totalorder %v2635_v26, %v2431_v46  ;;  %vm544_vm3 = vcmp.eq.s32.totalorder %v2635_v26, 4294967295 }
 0x225   : > { %1031 = vperm.xlu1 %2006, %v2470_v4   ;;  %vm925_vm9 = vmor %vm755_vm8, %vm893_vm2 }
 0x226   : > { %vm3012_vm12 = vmmov %vm3011_vm7  ;;  %v1283_v45 = vpop.f32.mrf.mxu2 }
 0x228   : > { %v338_v0 = vpop.permute.xlu2 %337 }
 0x229   : > { %vm405_vm0 = vcmp.eq.s32.totalorder %v338_v0, %v2433_v49 }
 0x22a   : > { %vm575_vm2 = vmor %vm405_vm0, %vm543_vm15 }
 0x22f   : > { %v984_v10 = vpop.permute.xlu1 %983 }
 0x230   : > { %vm1051_vm13 = vcmp.eq.s32.totalorder %v984_v10, %v2443_v56  ;;  %vm1052_vm14 = vcmp.eq.s32.totalorder %v984_v10, %v2446_v57 }
 0x231   : > { %vm1083_vm1 = vmor %vm913_vm5, %vm1051_vm13 }
 0x232   : > { %v1785_v4 = vsel %vm1083_vm1, 1.0, %v2181_v60  ;;  %vm1084_vm4 = vmor %vm914_vm10, %vm1052_vm14 }
 0x233   : > { %1273 = vmatmul.f32.gmra.mxu0 %v1785_v4  ;;  %v1786_v43 = vsel %vm1084_vm4, 1.0, %v2181_v60  ;;  %vm926_vm1 = vmor %vm756_vm6, %vm894_vm11  ;;  %vm406_vm4 = vcmp.eq.s32.totalorder %v338_v0, 4294967295  ;;  %v1494_v4 = vld [vmem:[#allocation7 + $0xc0] sm:$0xff]  ;;  %v1492_v0 = vld [vmem:[#allocation7 + $0xb0] sm:$0xff] }
 0x234   : > { %1812 = vmatmul.msk.f32.gmra.mxu1 %vm3011_vm7, %v1786_v43  ;;  %vm576_vm8 = vmor %vm406_vm4, %vm544_vm3  ;;  %vm3013_vm3 = vcmask 179200   ;;  %vm3014_vm4 = vnez %v2985_v41 }
 0x235   : > { %v1790_v18 = vsel %vm3014_vm4, 1.0, %v2181_v60 }
 0x237   : > { %v1020_v62 = vpop.permute.xlu1 %1019 }
 0x238   : > { %vm1063_vm5 = vcmp.eq.s32.totalorder %v1020_v62, %v2443_v56  ;;  %vm1064_vm13 = vcmp.eq.s32.totalorder %v1020_v62, %v2446_v57  ;;  %v820_v47 = vpop.permute.xlu2 %819 }
 0x239   : > { %vm1095_vm10 = vmor %vm925_vm9, %vm1063_vm5  ;;  %vm884_vm6 = vcmp.eq.s32.totalorder %v820_v47, 4294967295  ;;  %vm883_vm5 = vcmp.eq.s32.totalorder %v820_v47, %v2441_v54 }
 0x23a   : > { %v1797_v63 = vsel %vm1095_vm10, 1.0, %v2181_v60  ;;  %vm1096_vm14 = vmor %vm926_vm1, %vm1064_vm13  ;;  %vm1053_vm1 = vcmp.eq.s32.totalorder %v990_v16, %v2443_v56 }
 0x23b   : > { %1291 = vmatmul.f32.gmra.mxu2 %v1797_v63  ;;  %v1798_v37 = vsel %vm1096_vm14, 1.0, %v2181_v60  ;;  %vm1054_vm14 = vcmp.eq.s32.totalorder %v990_v16, %v2446_v57 }
 0x23c   : > { %1818 = vmatmul.msk.f32.gmra.mxu3 %vm3012_vm12, %v1798_v37 }
 0x247   : > { %v650_v5 = vpop.permute.xlu1 %649 }
 0x248   : > { %vm713_vm7 = vcmp.eq.s32.totalorder %v650_v5, %v2439_v52  ;;  %vm714_vm11 = vcmp.eq.s32.totalorder %v650_v5, 4294967295  ;;  %v516_v24 = vpop.permute.xlu2 %515 }
 0x249   : > { %vm745_vm9 = vmor %vm575_vm2, %vm713_vm7 }
 0x24a   : > { %vm746_vm13 = vmor %vm576_vm8, %vm714_vm11  ;;  %vm3016_vm8 = vnez %v3000_v34  ;;  %vm3018_vm11 = vnez %v3010_v14  ;;  %v1498_v14 = vld [vmem:[#allocation7 + $0xe0] sm:$0xff] }
 0x24b   : > { %vm916_vm10 = vmor %vm746_vm13, %vm884_vm6  ;;  %v1792_v19 = vsel %vm3016_vm8, 1.0, %v2181_v60  ;;  %v1794_v23 = vsel %vm3018_vm11, 1.0, %v2181_v60  ;;  %1539 = vmatpush.msrb.mxu2 %v1498_v14 }
 0x24c   : > { %vm915_vm12 = vmor %vm745_vm9, %vm883_vm5  ;;  %vm555_vm5 = vcmp.eq.s32.totalorder %v516_v24, %v2431_v46 }
 0x24d   : > { %vm1085_vm0 = vmor %vm915_vm12, %vm1053_vm1  ;;  %vm556_vm1 = vcmp.eq.s32.totalorder %v516_v24, 4294967295  ;;  %1540 = vmatpush.msrb.mxu2 %v1496_v36 }
 0x24e   : > { %v1787_v2 = vsel %vm1085_vm0, 1.0, %v2181_v60  ;;  %vm1086_vm15 = vmor %vm916_vm10, %vm1054_vm14 }
 0x24f   : > { %1276 = vmatmul.f32.gmra.mxu0 %v1787_v2  ;;  %v1788_v17 = vsel %vm1086_vm15, 1.0, %v2181_v60  ;;  %vm3015_vm2 = vmmov %vm3013_vm3  ;;  %1541 = vmatpush.msrb.mxu2 %v1494_v4 }
 0x250   : > { %1813 = vmatmul.msk.f32.gmra.mxu1 %vm3013_vm3, %v1788_v17  ;;  %vm3017_vm7 = vmmov %vm3015_vm2 }
 0x251   : > { %vm3019_vm6 = vmmov %vm3015_vm2  ;;  %1542 = vmatpush.msrb.mxu2 %v1492_v0 }
 0x257   : > { %v377_v22 = vpop.permute.xlu1 %376 }
 0x258   : > { %1814 = vmatmul.msk.f32.gmra.mxu1 %vm3015_vm2, %v1790_v18  ;;  %vm417_vm9 = vcmp.eq.s32.totalorder %v377_v22, %v2433_v49  ;;  %vm418_vm13 = vcmp.eq.s32.totalorder %v377_v22, 4294967295  ;;  %v856_v41 = vpop.permute.xlu2 %855  ;;  %v1490_v18 = vld [vmem:[#allocation7 + $0xa0] sm:$0xff] }
 0x259   : > { %vm587_vm14 = vmor %vm417_vm9, %vm555_vm5  ;;  %vm896_vm3 = vcmp.eq.s32.totalorder %v856_v41, 4294967295  ;;  %vm895_vm2 = vcmp.eq.s32.totalorder %v856_v41, %v2441_v54  ;;  %1543 = vmatpush.msrb.mxu2 %v1490_v18 }
 0x25a   : > { %vm588_vm0 = vmor %vm418_vm13, %vm556_vm1  ;;  %vm3020_vm13 = vcmask 179200  }
 0x260   : > { %1815 = vmatmul.msk.f32.gmra.mxu1 %vm3017_vm7, %v1792_v19 }
 0x267   : > { %v686_v25 = vpop.permute.xlu1 %685 }
 0x268   : > { %1816 = vmatmul.msk.f32.gmra.mxu1 %vm3019_vm6, %v1794_v23  ;;  %vm726_vm10 = vcmp.eq.s32.totalorder %v686_v25, 4294967295  ;;  %vm725_vm12 = vcmp.eq.s32.totalorder %v686_v25, %v2439_v52  ;;  %v384_v31 = vpop.permute.xlu2 %383 }
 0x269   : > { %vm758_vm15 = vmor %vm588_vm0, %vm726_vm10  ;;  %vm419_vm1 = vcmp.eq.s32.totalorder %v384_v31, %v2433_v49  ;;  %vm557_vm10 = vcmp.eq.s32.totalorder %v522_v32, %v2431_v46 }
 0x26a   : > { %vm757_vm4 = vmor %vm587_vm14, %vm725_vm12  ;;  %vm420_vm14 = vcmp.eq.s32.totalorder %v384_v31, 4294967295  ;;  %vm558_vm12 = vcmp.eq.s32.totalorder %v522_v32, 4294967295 }
 0x26b   : > { %vm928_vm8 = vmor %vm758_vm15, %vm896_vm3 }
 0x26c   : > { %vm927_vm6 = vmor %vm757_vm4, %vm895_vm2 }
 0x26d   : > { %vm589_vm0 = vmor %vm419_vm1, %vm557_vm10 }
 0x26e   : > { %vm590_vm3 = vmor %vm420_vm14, %vm558_vm12  ;;  %vm3021_vm14 = vcmask 179200   ;;  %vm1070_vm12 = vcmp.eq.s32.totalorder %v2644_v27, %v2446_v57  ;;  %v1268_v27 = vpop.f32.mrf.mxu0 }
 0x276   : > { %v1271_v20 = vpop.f32.mrf.mxu0 }
 0x277   : > { %v1026_v26 = vpop.permute.xlu1 %1025 }
 0x278   : > { %vm1065_vm7 = vcmp.eq.s32.totalorder %v1026_v26, %v2443_v56  ;;  %vm1066_vm11 = vcmp.eq.s32.totalorder %v1026_v26, %v2446_v57  ;;  %v862_v34 = vpop.permute.xlu2 %861 }
 0x279   : > { %vm1097_vm5 = vmor %vm927_vm6, %vm1065_vm7 }
 0x27a   : > { %v1799_v28 = vsel %vm1097_vm5, 1.0, %v2181_v60  ;;  %vm1098_vm9 = vmor %vm928_vm8, %vm1066_vm11  ;;  %vm897_vm8 = vcmp.eq.s32.totalorder %v862_v34, %v2441_v54  ;;  %vm898_vm11 = vcmp.eq.s32.totalorder %v862_v34, 4294967295  ;;  %v1327_v54 = vpop.f32.mrf.mxu1 }
 0x27b   : > { %1294 = vmatmul.f32.gmra.mxu2 %v1799_v28  ;;  %v1800_v29 = vsel %vm1098_vm9, 1.0, %v2181_v60  ;;  %v1328_v16 = vadd.f32 %v1327_v54, %v1262_v39  ;;  %v1489_v28 = vld [vmem:[#allocation7 + $0x98] sm:$0xff]  ;;  %v1484_v39 = vld [vmem:[#allocation7 + $0x70] sm:$0xff] }
 0x27c   : > { %1819 = vmatmul.msk.f32.gmra.mxu3 %vm3020_vm13, %v1800_v29  ;;  %v1488_v29 = vld [vmem:[#allocation7 + $0x90] sm:$0xff] }
 0x27d   : > { %1544 = vmatpush.msrb.mxu2 %v1488_v29 }
 0x286   : > { %v1286_v51 = vpop.f32.mrf.mxu2 }
 0x287   : > { %v692_v33 = vpop.permute.xlu1 %691 }
 0x288   : > { %vm727_vm15 = vcmp.eq.s32.totalorder %v692_v33, %v2439_v52  ;;  %vm728_vm4 = vcmp.eq.s32.totalorder %v692_v33, 4294967295 }
 0x289   : > { %vm759_vm2 = vmor %vm589_vm0, %vm727_vm15  ;;  %vm3022_vm0 = vnez %v2998_v30  ;;  %v1497_v30 = vld [vmem:[#allocation7 + $0xd8] sm:$0xff] }
 0x28a   : > { %vm760_vm7 = vmor %vm590_vm3, %vm728_vm4  ;;  %vm3024_vm4 = vcmp.lt.s32.totalorder %v2347_v7, 12 }
 0x28b   : > { %vm929_vm6 = vmor %vm759_vm2, %vm897_vm8 }
 0x28c   : > { %vm930_vm5 = vmor %vm760_vm7, %vm898_vm11 }
 0x28d   : > { %vm1102_vm15 = vmor %vm3022_vm0, %vm1070_vm12  ;;  %vm1532_vm12 = vcmask 1046534   ;;  %vm1535_vm0 = vcmask 1047559  }
 0x28e   : > { %v1804_v52 = vsel %vm1102_vm15, 1.0, %v2181_v60  ;;  %vm3023_vm3 = vmmov %vm3021_vm14  ;;  %v1289_v55 = vpop.f32.mrf.mxu2 }
 0x28f   : > { %vm3025_vm2 = vmmov %vm3024_vm4 }
 0x290   : > { %vm3026_vm8 = vmmov %vm3025_vm2 }
 0x291   : > { %vm3027_vm7 = vmmov %vm3025_vm2 }
 0x292   : > { %vm3028_vm11 = vmmov %vm3025_vm2 }
 0x297   : > { %v1032_v35 = vpop.permute.xlu1 %1031 }
 0x298   : > { %vm1067_vm9 = vcmp.eq.s32.totalorder %v1032_v35, %v2443_v56  ;;  %vm1068_vm13 = vcmp.eq.s32.totalorder %v1032_v35, %v2446_v57  ;;  %v1330_v56 = vpop.f32.mrf.mxu1  ;;  %v1499_v57 = vld [vmem:[#allocation7 + $0xe8] sm:$0xff] }
 0x299   : > { %vm1100_vm1 = vmor %vm930_vm5, %vm1068_vm13  ;;  %1559 = vmatpush.msra.mxu3 %v1499_v57  ;;  %v1331_v9 = vadd.f32 %v1330_v56, %v1265_v44  ;;  %v1487_v35 = vld [vmem:[#allocation7 + $0x88] sm:$0xff]  ;;  %vm1520_vm13 = vcmask 1042434  }
 0x29a   : > { %vm1099_vm10 = vmor %vm929_vm6, %vm1067_vm9  ;;  %v1802_v46 = vsel %vm1100_vm1, 1.0, %v2181_v60  ;;  %vm1517_vm9 = vcmask 1041409   ;;  %vm1523_vm1 = vcmask 1043459  }
 0x29b   : > { %v1801_v49 = vsel %vm1099_vm10, 1.0, %v2181_v60  ;;  %1820 = vmatmul.msk.f32.gmra.mxu3 %vm3021_vm14, %v1802_v46  ;;  %v2842_v60 = vpop.f32.mrf.mxu3  ;;  %v1381_v47 = vsel %vm3024_vm4, %v1331_v9, -inf  ;;  %v1486_v46 = vld [vmem:[#allocation7 + $0x80] sm:$0xff]  ;;  %vm3029_vm6 = vmmov %vm3025_vm2  ;;  %vm1526_vm10 = vcmask 1044484   ;;  %vm1529_vm14 = vcmask 1045509  }
 0x29c   : > { %1297 = vmatmul.f32.gmra.mxu2 %v1801_v49  ;;  %1560 = vmatpush.msra.mxu3 %v1497_v30  ;;  %v1401_v24 = vmax.f32 %v1328_v16, %v1381_v47  ;;  %v1471_v47 = vld [vmem:[#allocation7 + $0x8] sm:$0xff]  ;;  %vm3030_vm5 = vmmov %vm3025_vm2 }
 0x29d   : > { %1545 = vmatpush.msrb.mxu2 %v1486_v46 }
 0x29e   : > { %1561 = vmatpush.msra.mxu3 %v1495_v12  ;;  %v1402_v56 = vrot.slane %v1401_v24, 4  ;;  %v1477_v12 = vld [vmem:[#allocation7 + $0x38] sm:$0xff] }
 0x29f   : > { %1546 = vmatpush.msrb.mxu2 %v1484_v39 }
 0x2a0   : > { %v1333_v15 = vpop.f32.mrf.mxu1  ;;  %1562 = vmatpush.msra.mxu3 %v1493_v13  ;;  %v1476_v13 = vld [vmem:[#allocation7 + $0x30] sm:$0xff] }
 0x2a1   : > { %v1334_v19 = vadd.f32 %v1333_v15, %v1268_v27  ;;  %1547 = vmatpush.msrb.mxu2 %v1482_v50  ;;  %v1480_v27 = vld [vmem:[#allocation7 + $0x50] sm:$0xff] }
 0x2a2   : > { %1563 = vmatpush.msra.mxu3 %v1491_v61  ;;  %v1475_v61 = vld [vmem:[#allocation7 + $0x28] sm:$0xff] }
 0x2a3   : > { %1821 = vmatmul.msk.f32.gmra.mxu3 %vm3023_vm3, %v1804_v52  ;;  %v1354_v58 = vpop.f32.mrf.mxu3  ;;  %1548 = vmatpush.msrb.mxu2 %v1480_v27 }
 0x2a4   : > { %v1355_v22 = vadd.f32 %v1354_v58, %v1289_v55  ;;  %1564 = vmatpush.msra.mxu3 %v1489_v28 }
 0x2a6   : > { %v1389_v49 = vsel %vm3029_vm6, %v1355_v22, -inf  ;;  %1565 = vmatpush.msra.mxu3 %v1487_v35 }
 0x2a8   : > { %v1336_v38 = vpop.f32.mrf.mxu1 }
 0x2a9   : > { %v1337_v10 = vadd.f32 %v1336_v38, %v1271_v20  ;;  %v1485_v38 = vld [vmem:[#allocation7 + $0x78] sm:$0xff]  ;;  %v1479_v20 = vld [vmem:[#allocation7 + $0x48] sm:$0xff] }
 0x2aa   : > { %1566 = vmatpush.msra.mxu3 %v1485_v38 }
 0x2ab   : > { %v1383_v2 = vsel %vm3025_vm2, %v1337_v10, -inf }
 0x2ac   : > { %v1408_v31 = vmax.f32 %v1334_v19, %v1383_v2 }
 0x2b0   : > { %v1274_v3 = vpop.f32.mrf.mxu0 }
 0x2b1   : > { %v1339_v40 = vpop.f32.mrf.mxu1 }
 0x2b2   : > { %v1340_v25 = vadd.f32 %v1339_v40, %v1274_v3  ;;  %v1395_v3 = vrot.slane %v2619_v21, 4 }
 0x2b4   : > { %v1396_v9 = vmax.f32 %v2619_v21, %v1395_v3 }
 0x2be   : > { %v1292_v42 = vpop.f32.mrf.mxu2 }
 0x2bf   : > { %v1357_v59 = vpop.f32.mrf.mxu3 }
 0x2c0   : > { %v1358_v52 = vadd.f32 %v1357_v59, %v1292_v42  ;;  %v1474_v59 = vld [vmem:[#allocation7 + $0x20] sm:$0xff] }
 0x2cc   : > { %v1277_v8 = vpop.f32.mrf.mxu0 }
 0x2cd   : > { %v1342_v48 = vpop.f32.mrf.mxu1 }
 0x2ce   : > { %v1343_v43 = vadd.f32 %v1342_v48, %v1277_v8  ;;  %v1481_v48 = vld [vmem:[#allocation7 + $0x58] sm:$0xff] }
 0x2d0   : > { %v1385_v23 = vsel %vm3026_vm8, %v1343_v43, -inf  ;;  %v1473_v43 = vld [vmem:[#allocation7 + $0x18] sm:$0xff] }
 0x2d1   : > { %v1415_v33 = vmax.f32 %v1340_v25, %v1385_v23 }
 0x2d3   : > { %v1416_v44 = vrot.slane %v1415_v33, 4 }
 0x2d5   : > { %v1345_v53 = vpop.f32.mrf.mxu1  ;;  %v1417_v11 = vmax.f32 %v1415_v33, %v1416_v44 }
 0x2d6   : > { %v1346_v32 = vadd.f32 %v1345_v53, %v1280_v6  ;;  %v1409_v6 = vrot.slane %v1408_v31, 4  ;;  %v1478_v53 = vld [vmem:[#allocation7 + $0x40] sm:$0xff] }
 0x2d7   : > { %1549 = vmatpush.msrb.mxu2 %v1478_v53  ;;  %v1418_v10 = vrot.slane %v1417_v11, 2 }
 0x2d8   : > { %v1410_v55 = vmax.f32 %v1408_v31, %v1409_v6 }
 0x2d9   : > { %1550 = vmatpush.msrb.mxu2 %v1476_v13  ;;  %v1419_v18 = vmax.f32 %v1417_v11, %v1418_v10 }
 0x2db   : > { %1551 = vmatpush.msrb.mxu2 %v1474_v59 }
 0x2dd   : > { %v1348_v1 = vpop.f32.mrf.mxu1 }
 0x2de   : > { %v1349_v37 = vadd.f32 %v1348_v1, %v1283_v45  ;;  %v1483_v45 = vld [vmem:[#allocation7 + $0x68] sm:$0xff]  ;;  %v1411_v1 = vrot.slane %v1410_v55, 2 }
 0x2df   : > { %1567 = vmatpush.msra.mxu3 %v1483_v45 }
 0x2e0   : > { %v1387_v41 = vsel %vm3027_vm7, %v1349_v37, -inf  ;;  %v1412_v16 = vmax.f32 %v1410_v55, %v1411_v1 }
 0x2e1   : > { %v1422_v54 = vmax.f32 %v1346_v32, %v1387_v41  ;;  %1568 = vmatpush.msra.mxu3 %v1481_v48 }
 0x2e2   : > { %v1413_v23 = vrot.slane %v1412_v16, 1 }
 0x2e3   : > { %v1423_v57 = vrot.slane %v1422_v54, 4  ;;  %1569 = vmatpush.msra.mxu3 %v1479_v20 }
 0x2e4   : > { %v1414_v35 = vmax.f32 %v1412_v16, %v1413_v23 }
 0x2e5   : > { %v1351_v5 = vpop.f32.mrf.mxu1  ;;  %v1424_v14 = vmax.f32 %v1422_v54, %v1423_v57  ;;  %1570 = vmatpush.msra.mxu3 %v1477_v12  ;;  %v2008_v54 = vld [vmem:[%s2970_s2] ss:$0 sm:$0xff] }
 0x2e6   : > { %v1352_v26 = vadd.f32 %v1351_v5, %v1286_v51  ;;  %v1403_v51 = vmax.f32 %v1401_v24, %v1402_v56  ;;  %v1470_v5 = vld [vmem:[#allocation7] sm:$0xff] }
 0x2e7   : > { %1571 = vmatpush.msra.mxu3 %v1475_v61 }
 0x2e8   : > { %v1429_v15 = vmax.f32 %v1352_v26, %v1389_v49  ;;  %v1404_v42 = vrot.slane %v1403_v51, 2  ;;  %v1420_v26 = vrot.slane %v1419_v18, 1 }
 0x2e9   : > { %1572 = vmatpush.msra.mxu3 %v1473_v43 }
 0x2ea   : > { %v1430_v30 = vrot.slane %v1429_v15, 4  ;;  %v1405_v37 = vmax.f32 %v1403_v51, %v1404_v42  ;;  %v1421_v56 = vmax.f32 %v1419_v18, %v1420_v26 }
 0x2eb   : > { %1573 = vmatpush.msra.mxu3 %v1471_v47 }
 0x2ec   : > { %v1431_v36 = vmax.f32 %v1429_v15, %v1430_v30  ;;  %v1406_v21 = vrot.slane %v1405_v37, 1  ;;  %v2868_v48 = vadd.f32 %v2008_v54, %v1421_v56 }
 0x2ee   : > { %v1432_v0 = vrot.slane %v1431_v36, 2  ;;  %v1407_v32 = vmax.f32 %v1405_v37, %v1406_v21  ;;  %v1465_v55 = vmax.f32 %v2868_v48, 0.0 }
 0x2f0   : > { %v1433_v22 = vmax.f32 %v1431_v36, %v1432_v0  ;;  %v2864_v39 = vadd.f32 %v2008_v54, %v1407_v32  ;;  %v1522_v61 = vrot.slane %v1465_v55, 5 }
 0x2f2   : > { %v1434_v33 = vrot.slane %v1433_v22, 1  ;;  %v1463_v57 = vmax.f32 %v2864_v39, 0.0 }
 0x2f4   : > { %v1435_v6 = vmax.f32 %v1433_v22, %v1434_v33  ;;  %v1516_v11 = vrot.slane %v1463_v57, 7 }
 0x2f6   : > { %v2873_v27 = vadd.f32 %v2008_v54, %v1435_v6 }
 0x2f8   : > { %v1467_v12 = vmax.f32 %v2873_v27, 0.0 }
 0x2fa   : > { %v1528_v10 = vrot.slane %v1467_v12, 3 }
 0x2fe   : > { %v1295_v62 = vpop.f32.mrf.mxu2 }
 0x2ff   : > { %v1360_v63 = vpop.f32.mrf.mxu3 }
 0x300   : > { %v1361_v17 = vadd.f32 %v1360_v63, %v1295_v62  ;;  %v1472_v62 = vld [vmem:[#allocation7 + $0x10] sm:$0xff]  ;;  %v1425_v63 = vrot.slane %v1424_v14, 2 }
 0x301   : > { %1552 = vmatpush.msrb.mxu2 %v1472_v62 }
 0x302   : > { %v1391_v34 = vsel %vm3028_vm11, %v1361_v17, -inf  ;;  %v1397_v17 = vrot.slane %v1396_v9, 2  ;;  %v1426_v19 = vmax.f32 %v1424_v14, %v1425_v63 }
 0x303   : > { %v1436_v40 = vmax.f32 %v1358_v52, %v1391_v34  ;;  %1553 = vmatpush.msrb.mxu2 %v1470_v5 }
 0x304   : > { %v1398_v41 = vmax.f32 %v1396_v9, %v1397_v17  ;;  %v1427_v29 = vrot.slane %v1426_v19, 1 }
 0x305   : > { %v1437_v58 = vrot.slane %v1436_v40, 4 }
 0x306   : > { %v1399_v52 = vrot.slane %v1398_v41, 1  ;;  %v1428_v38 = vmax.f32 %v1426_v19, %v1427_v29 }
 0x307   : > { %v1438_v8 = vmax.f32 %v1436_v40, %v1437_v58  ;;  %v2866_v40 = vadd.f32 %v2008_v54, %v1414_v35 }
 0x308   : > { %v1400_v45 = vmax.f32 %v1398_v41, %v1399_v52  ;;  %v2870_v50 = vadd.f32 %v2008_v54, %v1428_v38 }
 0x309   : > { %v1439_v2 = vrot.slane %v1438_v8, 2  ;;  %v1464_v30 = vmax.f32 %v2866_v40, 0.0 }
 0x30a   : > { %v2878_v53 = vadd.f32 %v2008_v54, %v1400_v45  ;;  %v1466_v3 = vmax.f32 %v2870_v50, 0.0 }
 0x30b   : > { %v1440_v24 = vmax.f32 %v1438_v8, %v1439_v2  ;;  %v1519_v14 = vrot.slane %v1464_v30, 6  ;;  %v1502_v2 = vld [vmem:[%s2972_s4] sm:$0x3] }
 0x30c   : > { %v1462_v36 = vmax.f32 %v2878_v53, 0.0  ;;  %v1525_v1 = vrot.slane %v1466_v3, 4  ;;  %v1505_v17 = vperm.slane %v1502_v2, 1 }
 0x30d   : > { %v1441_v46 = vrot.slane %v1440_v24, 1 }
 0x30e   : > { %v1518_v9 = vsel %vm1517_vm9, %v1516_v11, %v1462_v36 }
 0x30f   : > { %v1442_v44 = vmax.f32 %v1440_v24, %v1441_v46  ;;  %v1504_v24 = vperm.slane %v1502_v2, 0 }
 0x311   : > { %v2876_v20 = vadd.f32 %v2008_v54, %v1442_v44 }
 0x313   : > { %v1468_v42 = vmax.f32 %v2876_v20, 0.0 }
 0x315   : > { %v1531_v43 = vrot.slane %v1468_v42, 2 }
 0x31e   : > { %v1363_v4 = vpop.f32.mrf.mxu3 }
 0x31f   : > { %v1298_v25 = vpop.f32.mrf.mxu2 }
 0x320   : > { %v1364_v34 = vadd.f32 %v1363_v4, %v1298_v25  ;;  %v1521_v4 = vsel %vm1520_vm13, %v1519_v14, %v1518_v9 }
 0x321   : > { %v1524_v63 = vsel %vm1523_vm1, %v1522_v61, %v1521_v4 }
 0x322   : > { %v1527_v37 = vsel %vm1526_vm10, %v1525_v1, %v1524_v63 }
 0x323   : > { %v1530_v0 = vsel %vm1529_vm14, %v1528_v10, %v1527_v37 }
 0x324   : > { %v1533_v5 = vsel %vm1532_vm12, %v1531_v43, %v1530_v0 }
 0x326   : > { %v1366_v28 = vpop.f32.mrf.mxu3 }
 0x327   : > { %v1367_v31 = vadd.f32 %v1366_v28, %v2842_v60 }
 0x329   : > { %v1393_v49 = vsel %vm3030_vm5, %v1367_v31, -inf }
 0x32a   : > { %v1443_v15 = vmax.f32 %v1364_v34, %v1393_v49 }
 0x32c   : > { %v1444_v60 = vrot.slane %v1443_v15, 4 }
 0x32e   : > { %v1445_v7 = vmax.f32 %v1443_v15, %v1444_v60 }
 0x330   : > { %v1446_v51 = vrot.slane %v1445_v7, 2 }
 0x332   : > { %v1447_v58 = vmax.f32 %v1445_v7, %v1446_v51 }
 0x334   : > { %v1448_v13 = vrot.slane %v1447_v58, 1 }
 0x336   : > { %v1449_v59 = vmax.f32 %v1447_v58, %v1448_v13 }
 0x338   : > { %v2893_v8 = vadd.f32 %v2008_v54, %v1449_v59 }
 0x33a   : > { %v1469_v62 = vmax.f32 %v2893_v8, 0.0 }
 0x33c   : > { %v1534_v47 = vrot.slane %v1469_v62, 1 }
 0x33e   : > { %v1536_v16 = vsel %vm1535_vm0, %v1534_v47, %v1533_v5 }
 0x33f   : > { %1554 = vmatmul.f32.vlgmr.msrb.gmra.mxu2 %v1536_v16  ;;  %1574 = vmatmul.f32.vlgmr.msra.gmra.mxu3 %v1536_v16 }
 0x3c2   : > { %v1575_v18 = vpop.f32.mrf.mxu3  ;;  %v1555_v25 = vpop.f32.mrf.mxu2 }
 0x3c3   : > { %v1576_v19 = vadd.f32 %v1575_v18, %v1505_v17  ;;  %v1556_v26 = vadd.f32 %v1555_v25, %v1504_v24 }
 0x3c5   : > { %v1822_v21 = vmul.f32 -1.442695, %v1576_v19  ;;  %v1578_v32 = vmax.f32 %v1556_v26, 0.0 }
 0x3c7   : > { %2009 = vpow2.f32 %v1822_v21  ;;  %v1598_v49 = vsub.f32 %v1578_v32, %v1536_v16 }
 0x3cd   : > { %v2010_v22 = vpop.eup %2009 }
 0x3ce   : > { %v1582_v23 = vadd.f32 1.0, %v2010_v22 }
 0x3d0   : > { %2011 = vrcp.f32 %v1582_v23  ;;  %v1594_v31 = vand.u32 2147483648, %v1582_v23  ;;  %v1592_v34 = vand.u32 2147483647, %v1582_v23  ;;  %vm1588_vm3 = vweird.f32 %v1582_v23 }
 0x3d2   : > { %v1595_v46 = vor.u32 1.1754944e-38, %v1594_v31  ;;  %vm1593_vm2 = vcmp.eq.f32.partialorder %v1592_v34, 8.507059e+37 }
 0x3d6   : > { %v2012_v41 = vpop.eup %2011 }
 0x3d7   : > { %v1584_v28 = vmul.f32 %v2012_v41, %v1582_v23  ;;  %vm1589_vm15 = vweird.f32 %v2012_v41 }
 0x3d8   : > { %vm1590_vm4 = vmor %vm1588_vm3, %vm1589_vm15 }
 0x3d9   : > { %v1585_v29 = vsub.f32 1.0, %v1584_v28 }
 0x3db   : > { %v1586_v33 = vmul.f32 %v2012_v41, %v1585_v29 }
 0x3dd   : > { %v1587_v35 = vadd.f32 %v2012_v41, %v1586_v33 }
 0x3df   : > { %v1591_v52 = vsel %vm1590_vm4, %v2012_v41, %v1587_v35 }
 0x3e0   : > { %v1596_v54 = vsel %vm1593_vm2, %v1595_v46, %v1591_v52 }
 0x3e1   : > { %v1599_v56 = vmul.f32 %v1598_v49, %v1596_v54 }
 0x3e3   : > { %v1601_v15 = vrot.slane %v1599_v56, 1  ;;  %v1602_v38 = vrot.slane %v1599_v56, 2  ;;  %v1603_v6 = vrot.slane %v1599_v56, 3  ;;  %v1604_v60 = vrot.slane %v1599_v56, 4 }
 0x3e4   : > { %v1605_v44 = vrot.slane %v1599_v56, 5  ;;  %v1606_v45 = vrot.slane %v1599_v56, 6  ;;  %v1607_v7 = vrot.slane %v1599_v56, 7  ;;  %v1616_v14 = vadd.f32 %v1599_v56, %v1462_v36 }
 0x3e5   : > { %v1617_v51 = vadd.f32 %v1601_v15, %v1463_v57  ;;  %v1618_v58 = vadd.f32 %v1602_v38, %v1464_v30  ;;  %v1619_v11 = vadd.f32 %v1603_v6, %v1465_v55  ;;  %v1620_v13 = vadd.f32 %v1604_v60, %v1466_v3 }
 0x3e6   : > { %v1621_v61 = vadd.f32 %v1605_v44, %v1467_v12  ;;  %v1622_v40 = vadd.f32 %v1606_v45, %v1468_v42  ;;  %v1623_v48 = vadd.f32 %v1607_v7, %v1469_v62 }
 0x3e7   : > { %v1632_v59 = vrot.slane %v1617_v51, 7  ;;  %v1634_v39 = vrot.slane %v1618_v58, 6  ;;  %v1636_v50 = vrot.slane %v1619_v11, 5  ;;  %v1638_v53 = vrot.slane %v1620_v13, 4 }
 0x3e8   : > { %v1640_v55 = vrot.slane %v1621_v61, 3  ;;  %v1642_v3 = vrot.slane %v1622_v40, 2  ;;  %v1644_v42 = vrot.slane %v1623_v48, 1 }
 0x3e9   : > { %v1633_v57 = vsel %vm1517_vm9, %v1632_v59, %v1616_v14 }
 0x3ea   : > { %v1635_v30 = vsel %vm1520_vm13, %v1634_v39, %v1633_v57 }
 0x3eb   : > { %v1637_v27 = vsel %vm1523_vm1, %v1636_v50, %v1635_v30 }
 0x3ec   : > { %v1639_v20 = vsel %vm1526_vm10, %v1638_v53, %v1637_v27 }
 0x3ed   : > { %v1641_v12 = vsel %vm1529_vm14, %v1640_v55, %v1639_v20 }
 0x3ee   : > { %v1643_v36 = vsel %vm1532_vm12, %v1642_v3, %v1641_v12 }
 0x3ef   : > { %v1645_v1 = vsel %vm1535_vm0, %v1644_v42, %v1643_v36 }
 0x3f0   : > { %1647 = vst [vmem:[%s274_s25] sm:$0xff] %v1645_v1 }
 0x3f1   : > { %2130 = shalt.err (!%p2127_p9)
}
 0x3f2   : > { %1872 = dma.vmem_to_hbm [thread:$0]  (%p2281_p4), %s1662_s30, 128, %s1664_s6, %s1649_s7  }
 0x3f3 PF: > { %s1675_s24 = sand.u32 1, %s2161_s18   ;;  %p3031_p10 = scmp.ge.s32.totalorder %s2173_s21, 2 }
 0x3f4   : > { %s1676_s11 = scalar_lea.sflag [#allocation4], %s1675_s24 }
 0x3f5   : > { %p1886_p13 = pnand %p3031_p10, %p2285_p6 }
 0x3f7   : > { %p1887_p11 = pneg %p1886_p13 }
 0x3f9   : > { %2156 = dma.done.wait (%p1887_p11), %s1676_s11, 128  }
 0x3fa   : > { %2158 = vsyncadd (%p1887_p11), %s1676_s11, 4294967168  ;;  %p19_p0 = scmp.ge.s32.totalorder %s2255_s14, 4   ;;  %s3032_s18 = smov %s2165_s19 }
 0x3fb   : > { %s3033_s19 = smov %s2169_s20  ;;  %s3034_s20 = smov %s2266_s17 }
 0x3fc   : > { %s3035_s21 = smov %s2255_s14  ;;  %21 = sbr.rel (!%p19_p0) target bundleno = 6 (0x6), region = 93 }
 0x401   :  { %1682 = vsyncpa [#allocation3], 1 }
 0x402   :  { %1684 = vsyncpa [#allocation3 + $0x1], 1 }
 0x403   :  { %1685 = vsyncpa [#allocation6], 1 }
 0x404   :  { %1686 = vsyncpa [#allocation4], 1 }
 0x405   :  { %1688 = vsyncpa [#allocation4 + $0x1], 1 }

</bundles_post_ra>
